<compile_context>
chip_gen: v6e
topology: v6e:2x2x1
jax: 0.10.0
libtpu: 0.0.40
codegen_flags: <defaults>
</compile_context>

<pallas_src>
import jax
import jax.numpy as jnp
from jax.experimental import pallas as pl
from jax.experimental.pallas import tpu as pltpu


def _ru(x, m):
    return (x + m - 1) // m * m


def _pad2(a, rows, cols):
    r, c = a.shape
    return jnp.pad(a, ((0, rows - r), (0, cols - c)))


# ----------------------------------------------------------------------------
# Fused Pallas kernel: L-layer GRU over the full sequence + Linear + LogSoftmax
# ----------------------------------------------------------------------------
def fused_decoder_kernel(*refs):
    """refs = [x2, h0, (wi, wh, brz, bhn) * L, out_w, out_b, logp, hT, gi_sc, seq_sc].

    x2     : (T*Bp, Ep)   f32   embedded tokens, time-major rows (row = t*Bp + b)
    h0     : (L, Bp, Hp)  f32   initial hidden state (padded)
    wi     : (Dp, 3*Hp)   bf16  merged per-gate input weights  [W_ir|W_iz|W_in]^T
    wh     : (Hp, 3*Hp)   bf16  merged per-gate hidden weights [W_hr|W_hz|W_hn]^T
    brz    : (1, 3*Hp)    f32   [b_ir+b_hr | b_iz+b_hz | b_in]
    bhn    : (1, Hp)      f32   b_hn (kept separate because of the r* multiply)
    out_w  : (Hp, Vp)     bf16  output projection (transposed)
    out_b  : (1, Vp)      f32   padded vocab columns hold -1e30
    logp   : (Bp, Vp)     f32   log-softmax(out(output[0]))
    hT     : (L, Bp, Hp)  f32   final hidden state (aliased with h0 in HBM)
    gi_sc  : (T*Bp, 3*Hp) f32   VMEM scratch: hoisted input-side gate pre-acts
    seq_sc : (T*Bp, Hp)   f32   VMEM scratch: current layer's outputs
    """
    x_ref, h0_ref = refs[0], refs[1]
    L, Bp, Hp = h0_ref.shape
    TBp = x_ref.shape[0]
    T = TBp // Bp

    layer_refs = refs[2:2 + 4 * L]
    wout_ref = refs[2 + 4 * L]
    bout_ref = refs[3 + 4 * L]
    logp_ref = refs[4 + 4 * L]
    hT_ref = refs[5 + 4 * L]
    gi_sc = refs[6 + 4 * L]
    seq_sc = refs[7 + 4 * L]

    # TODO(synk): for many layers / realistic H, make the layer loop a grid
    # axis with stacked per-layer weights so BlockSpec streams/double-buffers
    # layer l+1's weights behind layer l's recurrence.
    for l in range(L):
        wi_ref, wh_ref, brz_ref, bhn_ref = layer_refs[4 * l:4 * l + 4]

        xin = x_ref[...] if l == 0 else seq_sc[...]        # (T*Bp, Dp) f32
        x_b = xin.astype(jnp.bfloat16)

        # Hoisted input-side gate matmul: ALL timesteps, ALL 3 gates in one
        # large-M MXU pass (off the serial critical path).
        gi_sc[...] = (jnp.dot(x_b, wi_ref[...],
                              preferred_element_type=jnp.float32)
                      + brz_ref[...])

        wh = wh_ref[...]                                    # (Hp, 3Hp) bf16
        bhn_b = jnp.broadcast_to(bhn_ref[...], (Bp, Hp))    # hoisted broadcast
        is_top = (l == L - 1)

        def step(t, h, _wh=wh, _bhn=bhn_b, _is_top=is_top):
            row = pl.multiple_of(t * Bp, 8)                 # sublane-aligned
            g = gi_sc[pl.ds(row, Bp), :]                    # (Bp, 3Hp)
            # Single merged hidden-side matmul per timestep.
            gh = jnp.dot(h.astype(jnp.bfloat16), _wh,
                         preferred_element_type=jnp.float32)
            r = jax.nn.sigmoid(g[:, 0:Hp] + gh[:, 0:Hp])
            z = jax.nn.sigmoid(g[:, Hp:2 * Hp] + gh[:, Hp:2 * Hp])
            n = jnp.tanh(g[:, 2 * Hp:] + r * (gh[:, 2 * Hp:] + _bhn))
            h_new = (1.0 - z) * n + z * h
            if _is_top:
                # Only t == 0 of the top layer feeds the output head; the
                # final hidden is carried in `h` -> skip the other stores.
                @pl.when(t == 0)
                def _():
                    seq_sc[0:Bp, :] = h_new
            else:
                seq_sc[pl.ds(row, Bp), :] = h_new           # stays in VMEM
            return h_new

        h_fin = jax.lax.fori_loop(0, T, step, h0_ref[l], unroll=True)
        hT_ref[l] = h_fin                                   # written once/layer

    # Output head on output[0] (top layer, first timestep): Linear + LogSoftmax.
    # TODO(synk): for realistic vocab sizes (bf16 (H,V) > VMEM, esp. v7x 64MiB)
    # tile over V with an online max/LSE; at Vp=128 the head fits trivially.
    h_top0 = seq_sc[0:Bp, :].astype(jnp.bfloat16)           # (Bp, Hp)
    logits = jnp.dot(h_top0, wout_ref[...],
                     preferred_element_type=jnp.float32) + bout_ref[...]
    m = jnp.max(logits, axis=-1, keepdims=True)
    s = logits - m
    lse = jnp.log(jnp.sum(jnp.exp(s), axis=-1, keepdims=True))
    logp_ref[...] = s - lse


# ----------------------------------------------------------------------------
# Wrapper
# ----------------------------------------------------------------------------
def _full_spec(shape):
    """Whole-array VMEM block for a grid=(1,) call."""
    zeros = (0,) * len(shape)
    return pl.BlockSpec(shape, lambda i, z=zeros: z)


def fused_decoder(x2, h0, gru_layers, out_w_t, out_b):
    """x2: (T*Bp, Ep) f32 time-major; h0: (L, Bp, Hp) f32 (padded)."""
    TBp, _ = x2.shape
    L, Bp, Hp = h0.shape
    Vp = out_w_t.shape[-1]
    T = TBp // Bp

    inputs = [x2, h0]
    for (wi, wh, brz, bhn) in gru_layers:
        inputs += [wi, wh, brz, bhn]
    inputs += [out_w_t, out_b]

    # VMEM budget: inputs (x2 double-buffer pessimism) + outputs + scratch + margin.
    in_bytes = sum(int(a.size) * a.dtype.itemsize for a in inputs)
    out_bytes = Bp * Vp * 4 + L * Bp * Hp * 4
    scr_bytes = TBp * 3 * Hp * 4 + TBp * Hp * 4
    vmem_limit = int(min(max(2 * (in_bytes + out_bytes) + scr_bytes + (4 << 20),
                             16 << 20), 112 << 20))

    # TODO(synk): on v7x (2 TensorCores) add a batch grid axis marked "parallel"
    # (or core_map) so each core runs half the batch's recurrence.
    logp, hT = pl.pallas_call(
        fused_decoder_kernel,
        out_shape=(jax.ShapeDtypeStruct((Bp, Vp), jnp.float32),
                   jax.ShapeDtypeStruct((L, Bp, Hp), jnp.float32)),
        grid_spec=pltpu.PrefetchScalarGridSpec(
            num_scalar_prefetch=0,
            grid=(1,),
            in_specs=[_full_spec(a.shape) for a in inputs],
            out_specs=[_full_spec((Bp, Vp)), _full_spec((L, Bp, Hp))],
            scratch_shapes=[pltpu.VMEM((TBp, 3 * Hp), jnp.float32),
                            pltpu.VMEM((TBp, Hp), jnp.float32)],
        ),
        input_output_aliases={1: 1},          # h0 -> hT reuse the HBM buffer
        compiler_params=pltpu.CompilerParams(
            dimension_semantics=("arbitrary",),
            vmem_limit_bytes=vmem_limit),
    )(*inputs)
    return logp, hT


@jax.jit
def decoder_forward(params, token_ids, hidden, encoder_outputs=None, mask=None):
    """DecoderRNN.forward.  token_ids: (B, T) int32, hidden: (L, B, H).

    encoder_outputs / mask are accepted (like the PyTorch module) but unused.
    """
    # embedding lookup + permute(1, 0, 2) -> (T, B, E)  (plain-JAX glue;
    # `embedded` is itself a return value so it must be materialized anyway).
    # TODO(synk): fold the gather into the kernel via scalar-prefetched ids +
    # pl.Element row-gather to avoid the x2 HBM round-trip for long T.
    embedded = jnp.take(params["embedding"], token_ids, axis=0)   # (B, T, E)
    embedded = jnp.transpose(embedded, (1, 0, 2))                 # (T, B, E)
    # TODO(synk): training-mode dropout (p=dropout_p) not implemented; the
    # eval/inference forward is deterministic (dropout == identity).

    T, B, E = embedded.shape
    L, _, H = hidden.shape
    V = params["embedding"].shape[0]
    Ep = params["gru"][0][0].shape[0]          # padded emb dim
    Hp = params["gru"][0][1].shape[0]          # padded hidden dim
    Bp = _ru(B, 8)

    # Pad to tile-aligned shapes (lane-dense Ep/Hp, sublane-dense Bp).
    x2 = jnp.pad(embedded, ((0, 0), (0, Bp - B), (0, Ep - E))).reshape(T * Bp, Ep)
    h0 = jnp.pad(hidden, ((0, 0), (0, Bp - B), (0, Hp - H)))

    logp_p, hT_p = fused_decoder(x2, h0, params["gru"],
                                 params["out_w_t"], params["out_b"])

    logp = logp_p[:B, :V]
    new_hidden = hT_p[:, :B, :H]
    return 0, logp[None, ...], new_hidden, embedded


# ----------------------------------------------------------------------------
# Plain-JAX reference (f32, PyTorch-style weights) for correctness check
# ----------------------------------------------------------------------------
def reference_forward(params_f32, token_ids, hidden):
    embedded = jnp.transpose(jnp.take(params_f32["embedding"], token_ids, axis=0),
                             (1, 0, 2))
    x = embedded
    new_hidden = []
    for l in range(len(params_f32["gru"])):
        w_ih_t, w_hh_t, b_ih, b_hh = params_f32["gru"][l]
        H = hidden.shape[-1]
        h = hidden[l]
        ys = []
        for t in range(x.shape[0]):
            gi = x[t] @ w_ih_t + b_ih
            gh = h @ w_hh_t + b_hh
            r = jax.nn.sigmoid(gi[:, :H] + gh[:, :H])
            z = jax.nn.sigmoid(gi[:, H:2 * H] + gh[:, H:2 * H])
            n = jnp.tanh(gi[:, 2 * H:] + r * gh[:, 2 * H:])
            h = (1.0 - z) * n + z * h
            ys.append(h)
        x = jnp.stack(ys, axis=0)
        new_hidden.append(h)
    new_hidden = jnp.stack(new_hidden, axis=0)
    logits = x[0] @ params_f32["out_w_t"] + params_f32["out_b"]
    logp = jax.nn.log_softmax(logits, axis=-1)
    return logp[None, ...], new_hidden, embedded


# ----------------------------------------------------------------------------
# Parameter construction (deterministic, synthetic) + kernel-layout prep
# ----------------------------------------------------------------------------
def make_params(key, vocab, emb_dim, hidden, num_layers):
    keys = jax.random.split(key, 4 + 4 * num_layers)
    scale = 0.1
    params = {
        "embedding": scale * jax.random.normal(keys[0], (vocab, emb_dim), jnp.float32),
        "out_w_t": scale * jax.random.normal(keys[1], (hidden, vocab), jnp.float32),
        "out_b": scale * jax.random.normal(keys[2], (1, vocab), jnp.float32),
        "gru": [],
    }
    for l in range(num_layers):
        d_in = emb_dim if l == 0 else hidden
        k = keys[4 + 4 * l: 8 + 4 * l]
        w_ih_t = scale * jax.random.normal(k[0], (d_in, 3 * hidden), jnp.float32)
        w_hh_t = scale * jax.random.normal(k[1], (hidden, 3 * hidden), jnp.float32)
        b_ih = scale * jax.random.normal(k[2], (1, 3 * hidden), jnp.float32)
        b_hh = scale * jax.random.normal(k[3], (1, 3 * hidden), jnp.float32)
        params["gru"].append((w_ih_t, w_hh_t, b_ih, b_hh))
    return params


def prep_kernel_params(params_f32, hidden, emb_dim):
    """Convert f32 PyTorch-style (transposed) weights into the fused-kernel
    layout: merged per-gate bf16 weights + folded f32 biases, all padded to
    lane-dense (multiple-of-128) gate blocks. Zero padding keeps the padded
    hidden columns exactly zero through the recurrence."""
    H = hidden
    Hp = _ru(H, 128)
    Ep = _ru(emb_dim, 128)
    V = params_f32["out_w_t"].shape[1]
    Vp = _ru(V, 128)

    out_w = _pad2(params_f32["out_w_t"], Hp, Vp).astype(jnp.bfloat16)
    out_b = jnp.full((1, Vp), -1e30, jnp.float32).at[:, :V].set(params_f32["out_b"])

    kp = {
        "embedding": params_f32["embedding"],
        "out_w_t": out_w,
        "out_b": out_b,
        "gru": [],
    }
    for l, (w_ih_t, w_hh_t, b_ih, b_hh) in enumerate(params_f32["gru"]):
        Dp = Ep if l == 0 else Hp

        def g3(w):  # (X, 3H) -> three (X, H) gate blocks [r, z, n]
            return w[:, 0:H], w[:, H:2 * H], w[:, 2 * H:3 * H]

        wir, wiz, win = g3(w_ih_t)
        whr, whz, whn = g3(w_hh_t)
        bir, biz, bin_ = g3(b_ih)
        bhr, bhz, bhn = g3(b_hh)

        wi_cat = jnp.concatenate(
            [_pad2(wir, Dp, Hp), _pad2(wiz, Dp, Hp), _pad2(win, Dp, Hp)],
            axis=1).astype(jnp.bfloat16)                       # (Dp, 3Hp)
        wh_cat = jnp.concatenate(
            [_pad2(whr, Hp, Hp), _pad2(whz, Hp, Hp), _pad2(whn, Hp, Hp)],
            axis=1).astype(jnp.bfloat16)                       # (Hp, 3Hp)
        brz_cat = jnp.concatenate(
            [_pad2(bir + bhr, 1, Hp), _pad2(biz + bhz, 1, Hp), _pad2(bin_, 1, Hp)],
            axis=1)                                            # (1, 3Hp) f32
        bhn_p = _pad2(bhn, 1, Hp)                              # (1, Hp) f32
        kp["gru"].append((wi_cat, wh_cat, brz_cat, bhn_p))
    return kp


# ----------------------------------------------------------------------------
if __name__ == "__main__":
    # small shapes consistent with the module
    B, T = 4, 2                 # batch, decode sequence length
    HIDDEN = 32                 # hidden_size
    EMB = 32                    # embedding_dim
    VOCAB = 128                 # output_size
    LAYERS = 2                  # num_layers
    MAX_LEN = 8                 # max_length (encoder_outputs / mask unused)

    key = jax.random.PRNGKey(0)
    k_par, k_ids = jax.random.split(key)
    params_f32 = make_params(k_par, VOCAB, EMB, HIDDEN, LAYERS)
    params = prep_kernel_params(params_f32, HIDDEN, EMB)

    token_ids = jax.random.randint(k_ids, (B, T), 0, VOCAB, dtype=jnp.int32)
    hidden0 = jnp.zeros((LAYERS, B, HIDDEN), jnp.float32)         # initHidden
    encoder_outputs = jnp.zeros((MAX_LEN, B, HIDDEN), jnp.float32)
    mask = jnp.ones((B, MAX_LEN), jnp.float32)

    zero, logp, new_hidden, embedded = decoder_forward(
        params, token_ids, hidden0, encoder_outputs, mask)
    jax.block_until_ready((logp, new_hidden, embedded))

    # correctness check against an f32 pure-JAX reference (kernel uses bf16
    # weights with f32 accumulation, so a modest tolerance is expected)
    ref_logp, ref_hidden, ref_emb = reference_forward(params_f32, token_ids, hidden0)
    assert logp.shape == (1, B, VOCAB)
    assert new_hidden.shape == (LAYERS, B, HIDDEN)
    assert embedded.shape == (T, B, EMB)
    assert jnp.allclose(logp, ref_logp, atol=5e-3, rtol=5e-3)
    assert jnp.allclose(new_hidden, ref_hidden, atol=5e-3, rtol=5e-3)
    assert jnp.allclose(embedded, ref_emb, atol=1e-6, rtol=1e-6)

    print("KERNEL_OK")
</pallas_src>

<mosaic_0001>
module attributes {stable_mosaic.version = 11 : i64} {
  func.func @fused_decoder_kernel(%arg0: i32, %arg1: memref<16x128xf32, #tpu.memory_space<vmem>>, %arg2: memref<2x8x128xf32, #tpu.memory_space<vmem>>, %arg3: memref<128x384xbf16, #tpu.memory_space<vmem>>, %arg4: memref<128x384xbf16, #tpu.memory_space<vmem>>, %arg5: memref<1x384xf32, #tpu.memory_space<vmem>>, %arg6: memref<1x128xf32, #tpu.memory_space<vmem>>, %arg7: memref<128x384xbf16, #tpu.memory_space<vmem>>, %arg8: memref<128x384xbf16, #tpu.memory_space<vmem>>, %arg9: memref<1x384xf32, #tpu.memory_space<vmem>>, %arg10: memref<1x128xf32, #tpu.memory_space<vmem>>, %arg11: memref<128x128xbf16, #tpu.memory_space<vmem>>, %arg12: memref<1x128xf32, #tpu.memory_space<vmem>>, %arg13: memref<8x128xf32, #tpu.memory_space<vmem>>, %arg14: memref<2x8x128xf32, #tpu.memory_space<vmem>>, %arg15: memref<16x384xf32, #tpu.memory_space<vmem>>, %arg16: memref<16x128xf32, #tpu.memory_space<vmem>>) attributes {dimension_semantics = [#tpu.dimension_semantics<arbitrary>], iteration_bounds = array<i64: 1>, scalar_prefetch = 0 : i64, scratch_operands = 2 : i64, tpu.core_type = #tpu.core_type<tc>, window_params = [{pipeline_mode = #tpu.pipeline_mode<synchronous>, transform_indices = @transform_0, window_bounds = array<i64: 16, 128>}, {pipeline_mode = #tpu.pipeline_mode<synchronous>, transform_indices = @transform_1, window_bounds = array<i64: 2, 8, 128>}, {pipeline_mode = #tpu.pipeline_mode<synchronous>, transform_indices = @transform_2, window_bounds = array<i64: 128, 384>}, {pipeline_mode = #tpu.pipeline_mode<synchronous>, transform_indices = @transform_3, window_bounds = array<i64: 128, 384>}, {pipeline_mode = #tpu.pipeline_mode<synchronous>, transform_indices = @transform_4, window_bounds = array<i64: 1, 384>}, {pipeline_mode = #tpu.pipeline_mode<synchronous>, transform_indices = @transform_5, window_bounds = array<i64: 1, 128>}, {pipeline_mode = #tpu.pipeline_mode<synchronous>, transform_indices = @transform_6, window_bounds = array<i64: 128, 384>}, {pipeline_mode = #tpu.pipeline_mode<synchronous>, transform_indices = @transform_7, window_bounds = array<i64: 128, 384>}, {pipeline_mode = #tpu.pipeline_mode<synchronous>, transform_indices = @transform_8, window_bounds = array<i64: 1, 384>}, {pipeline_mode = #tpu.pipeline_mode<synchronous>, transform_indices = @transform_9, window_bounds = array<i64: 1, 128>}, {pipeline_mode = #tpu.pipeline_mode<synchronous>, transform_indices = @transform_10, window_bounds = array<i64: 128, 128>}, {pipeline_mode = #tpu.pipeline_mode<synchronous>, transform_indices = @transform_11, window_bounds = array<i64: 1, 128>}, {pipeline_mode = #tpu.pipeline_mode<synchronous>, transform_indices = @transform_12, window_bounds = array<i64: 8, 128>}, {pipeline_mode = #tpu.pipeline_mode<synchronous>, transform_indices = @transform_13, window_bounds = array<i64: 2, 8, 128>}]} {
    %c0 = arith.constant 0 : index
    %c0_0 = arith.constant 0 : index
    %0 = vector.load %arg1[%c0, %c0_0] : memref<16x128xf32, #tpu.memory_space<vmem>>, vector<16x128xf32>
    %1 = arith.truncf %0 : vector<16x128xf32> to vector<16x128xbf16>
    %c0_1 = arith.constant 0 : index
    %c0_2 = arith.constant 0 : index
    %2 = vector.load %arg3[%c0_1, %c0_2] : memref<128x384xbf16, #tpu.memory_space<vmem>>, vector<128x384xbf16>
    %cst = arith.constant dense<0.000000e+00> : vector<16x384xf32>
    %3 = tpu.matmul %1, %2, %cst {dimension_numbers = #tpu.dot_dimension_numbers<[1], [0], [0], [1], [0, 0, 1, 1], [], []>} : vector<16x128xbf16>, vector<128x384xbf16>, vector<16x384xf32> -> vector<16x384xf32>
    %c0_3 = arith.constant 0 : index
    %c0_4 = arith.constant 0 : index
    %4 = vector.load %arg5[%c0_3, %c0_4] : memref<1x384xf32, #tpu.memory_space<vmem>>, vector<1x384xf32>
    %5 = vector.broadcast %4 : vector<1x384xf32> to vector<16x384xf32>
    %6 = arith.addf %3, %5 : vector<16x384xf32>
    %c0_5 = arith.constant 0 : index
    %c0_6 = arith.constant 0 : index
    %7 = vector.load %arg15[%c0_5, %c0_6] : memref<16x384xf32, #tpu.memory_space<vmem>>, vector<16x384xf32>
    tpu.vector_store %arg15[%c0_5, %c0_6], %6 {strides = array<i32>} : memref<16x384xf32, #tpu.memory_space<vmem>>, vector<16x384xf32>,
    %c0_7 = arith.constant 0 : index
    %c0_8 = arith.constant 0 : index
    %8 = vector.load %arg4[%c0_7, %c0_8] : memref<128x384xbf16, #tpu.memory_space<vmem>>, vector<128x384xbf16>
    %c0_9 = arith.constant 0 : index
    %c0_10 = arith.constant 0 : index
    %9 = vector.load %arg6[%c0_9, %c0_10] : memref<1x128xf32, #tpu.memory_space<vmem>>, vector<1x128xf32>
    %10 = vector.shape_cast %9 : vector<1x128xf32> to vector<1x128xf32>
    %11 = vector.broadcast %10 : vector<1x128xf32> to vector<8x128xf32>
    %c0_11 = arith.constant 0 : index
    %c0_12 = arith.constant 0 : index
    %c0_13 = arith.constant 0 : index
    %12 = vector.load %arg2[%c0_11, %c0_12, %c0_13] : memref<2x8x128xf32, #tpu.memory_space<vmem>>, vector<1x8x128xf32>
    %13 = vector.shape_cast %12 : vector<1x8x128xf32> to vector<8x128xf32>
    %c0_i32 = arith.constant 0 : i32
    %c8_i32 = arith.constant 8 : i32
    %14 = arith.muli %c0_i32, %c8_i32 : i32
    %15 = tpu.assume_multiple %14, 8 : i32
    %16 = arith.index_cast %15 : i32 to index
    %c0_14 = arith.constant 0 : index
    %17 = vector.load %arg15[%16, %c0_14] : memref<16x384xf32, #tpu.memory_space<vmem>>, vector<8x384xf32>
    %18 = arith.truncf %13 : vector<8x128xf32> to vector<8x128xbf16>
    %cst_15 = arith.constant dense<0.000000e+00> : vector<8x384xf32>
    %19 = tpu.matmul %18, %8, %cst_15 {dimension_numbers = #tpu.dot_dimension_numbers<[1], [0], [0], [1], [0, 0, 1, 1], [], []>} : vector<8x128xbf16>, vector<128x384xbf16>, vector<8x384xf32> -> vector<8x384xf32>
    %20 = vector.extract_strided_slice %17 {offsets = [0, 0], sizes = [8, 128], strides = [1, 1]} : vector<8x384xf32> to vector<8x128xf32>
    %21 = vector.extract_strided_slice %19 {offsets = [0, 0], sizes = [8, 128], strides = [1, 1]} : vector<8x384xf32> to vector<8x128xf32>
    %22 = arith.addf %20, %21 : vector<8x128xf32>
    %23 = arith.negf %22 : vector<8x128xf32>
    %24 = math.exp %23 : vector<8x128xf32>
    %cst_16 = arith.constant 1.000000e+00 : f32
    %25 = vector.broadcast %cst_16 : f32 to vector<8x128xf32>
    %26 = arith.addf %25, %24 : vector<8x128xf32>
    %27 = arith.divf %25, %26 : vector<8x128xf32>
    %28 = vector.extract_strided_slice %17 {offsets = [0, 128], sizes = [8, 128], strides = [1, 1]} : vector<8x384xf32> to vector<8x128xf32>
    %29 = vector.extract_strided_slice %19 {offsets = [0, 128], sizes = [8, 128], strides = [1, 1]} : vector<8x384xf32> to vector<8x128xf32>
    %30 = arith.addf %28, %29 : vector<8x128xf32>
    %31 = arith.negf %30 : vector<8x128xf32>
    %32 = math.exp %31 : vector<8x128xf32>
    %cst_17 = arith.constant 1.000000e+00 : f32
    %33 = vector.broadcast %cst_17 : f32 to vector<8x128xf32>
    %34 = arith.addf %33, %32 : vector<8x128xf32>
    %35 = arith.divf %33, %34 : vector<8x128xf32>
    %36 = vector.extract_strided_slice %17 {offsets = [0, 256], sizes = [8, 128], strides = [1, 1]} : vector<8x384xf32> to vector<8x128xf32>
    %37 = vector.extract_strided_slice %19 {offsets = [0, 256], sizes = [8, 128], strides = [1, 1]} : vector<8x384xf32> to vector<8x128xf32>
    %38 = arith.addf %37, %11 : vector<8x128xf32>
    %39 = arith.mulf %27, %38 : vector<8x128xf32>
    %40 = arith.addf %36, %39 : vector<8x128xf32>
    %41 = math.tanh %40 : vector<8x128xf32>
    %cst_18 = arith.constant 1.000000e+00 : f32
    %42 = vector.broadcast %cst_18 : f32 to vector<8x128xf32>
    %43 = arith.subf %42, %35 : vector<8x128xf32>
    %44 = arith.mulf %43, %41 : vector<8x128xf32>
    %45 = arith.mulf %35, %13 : vector<8x128xf32>
    %46 = arith.addf %44, %45 : vector<8x128xf32>
    %47 = arith.index_cast %15 : i32 to index
    %c0_19 = arith.constant 0 : index
    %48 = vector.load %arg16[%47, %c0_19] : memref<16x128xf32, #tpu.memory_space<vmem>>, vector<8x128xf32>
    tpu.vector_store %arg16[%47, %c0_19], %46 {strides = array<i32>} : memref<16x128xf32, #tpu.memory_space<vmem>>, vector<8x128xf32>,
    %c1_i32 = arith.constant 1 : i32
    %c8_i32_20 = arith.constant 8 : i32
    %49 = arith.muli %c1_i32, %c8_i32_20 : i32
    %50 = tpu.assume_multiple %49, 8 : i32
    %51 = arith.index_cast %50 : i32 to index
    %c0_21 = arith.constant 0 : index
    %52 = vector.load %arg15[%51, %c0_21] : memref<16x384xf32, #tpu.memory_space<vmem>>, vector<8x384xf32>
    %53 = arith.truncf %46 : vector<8x128xf32> to vector<8x128xbf16>
    %cst_22 = arith.constant dense<0.000000e+00> : vector<8x384xf32>
    %54 = tpu.matmul %53, %8, %cst_22 {dimension_numbers = #tpu.dot_dimension_numbers<[1], [0], [0], [1], [0, 0, 1, 1], [], []>} : vector<8x128xbf16>, vector<128x384xbf16>, vector<8x384xf32> -> vector<8x384xf32>
    %55 = vector.extract_strided_slice %52 {offsets = [0, 0], sizes = [8, 128], strides = [1, 1]} : vector<8x384xf32> to vector<8x128xf32>
    %56 = vector.extract_strided_slice %54 {offsets = [0, 0], sizes = [8, 128], strides = [1, 1]} : vector<8x384xf32> to vector<8x128xf32>
    %57 = arith.addf %55, %56 : vector<8x128xf32>
    %58 = arith.negf %57 : vector<8x128xf32>
    %59 = math.exp %58 : vector<8x128xf32>
    %cst_23 = arith.constant 1.000000e+00 : f32
    %60 = vector.broadcast %cst_23 : f32 to vector<8x128xf32>
    %61 = arith.addf %60, %59 : vector<8x128xf32>
    %62 = arith.divf %60, %61 : vector<8x128xf32>
    %63 = vector.extract_strided_slice %52 {offsets = [0, 128], sizes = [8, 128], strides = [1, 1]} : vector<8x384xf32> to vector<8x128xf32>
    %64 = vector.extract_strided_slice %54 {offsets = [0, 128], sizes = [8, 128], strides = [1, 1]} : vector<8x384xf32> to vector<8x128xf32>
    %65 = arith.addf %63, %64 : vector<8x128xf32>
    %66 = arith.negf %65 : vector<8x128xf32>
    %67 = math.exp %66 : vector<8x128xf32>
    %cst_24 = arith.constant 1.000000e+00 : f32
    %68 = vector.broadcast %cst_24 : f32 to vector<8x128xf32>
    %69 = arith.addf %68, %67 : vector<8x128xf32>
    %70 = arith.divf %68, %69 : vector<8x128xf32>
    %71 = vector.extract_strided_slice %52 {offsets = [0, 256], sizes = [8, 128], strides = [1, 1]} : vector<8x384xf32> to vector<8x128xf32>
    %72 = vector.extract_strided_slice %54 {offsets = [0, 256], sizes = [8, 128], strides = [1, 1]} : vector<8x384xf32> to vector<8x128xf32>
    %73 = arith.addf %72, %11 : vector<8x128xf32>
    %74 = arith.mulf %62, %73 : vector<8x128xf32>
    %75 = arith.addf %71, %74 : vector<8x128xf32>
    %76 = math.tanh %75 : vector<8x128xf32>
    %cst_25 = arith.constant 1.000000e+00 : f32
    %77 = vector.broadcast %cst_25 : f32 to vector<8x128xf32>
    %78 = arith.subf %77, %70 : vector<8x128xf32>
    %79 = arith.mulf %78, %76 : vector<8x128xf32>
    %80 = arith.mulf %70, %46 : vector<8x128xf32>
    %81 = arith.addf %79, %80 : vector<8x128xf32>
    %82 = arith.index_cast %50 : i32 to index
    %c0_26 = arith.constant 0 : index
    %83 = vector.load %arg16[%82, %c0_26] : memref<16x128xf32, #tpu.memory_space<vmem>>, vector<8x128xf32>
    tpu.vector_store %arg16[%82, %c0_26], %81 {strides = array<i32>} : memref<16x128xf32, #tpu.memory_space<vmem>>, vector<8x128xf32>,
    %c2_i32 = arith.constant 2 : i32
    %c0_27 = arith.constant 0 : index
    %c0_28 = arith.constant 0 : index
    %c0_29 = arith.constant 0 : index
    %84 = vector.load %arg14[%c0_27, %c0_28, %c0_29] : memref<2x8x128xf32, #tpu.memory_space<vmem>>, vector<1x8x128xf32>
    %85 = vector.shape_cast %84 : vector<1x8x128xf32> to vector<8x128xf32>
    %86 = vector.shape_cast %81 : vector<8x128xf32> to vector<1x8x128xf32>
    tpu.vector_store %arg14[%c0_27, %c0_28, %c0_29], %86 {strides = array<i32>} : memref<2x8x128xf32, #tpu.memory_space<vmem>>, vector<1x8x128xf32>,
    %c0_30 = arith.constant 0 : index
    %c0_31 = arith.constant 0 : index
    %87 = vector.load %arg16[%c0_30, %c0_31] : memref<16x128xf32, #tpu.memory_space<vmem>>, vector<16x128xf32>
    %88 = arith.truncf %87 : vector<16x128xf32> to vector<16x128xbf16>
    %c0_32 = arith.constant 0 : index
    %c0_33 = arith.constant 0 : index
    %89 = vector.load %arg7[%c0_32, %c0_33] : memref<128x384xbf16, #tpu.memory_space<vmem>>, vector<128x384xbf16>
    %cst_34 = arith.constant dense<0.000000e+00> : vector<16x384xf32>
    %90 = tpu.matmul %88, %89, %cst_34 {dimension_numbers = #tpu.dot_dimension_numbers<[1], [0], [0], [1], [0, 0, 1, 1], [], []>} : vector<16x128xbf16>, vector<128x384xbf16>, vector<16x384xf32> -> vector<16x384xf32>
    %c0_35 = arith.constant 0 : index
    %c0_36 = arith.constant 0 : index
    %91 = vector.load %arg9[%c0_35, %c0_36] : memref<1x384xf32, #tpu.memory_space<vmem>>, vector<1x384xf32>
    %92 = vector.broadcast %91 : vector<1x384xf32> to vector<16x384xf32>
    %93 = arith.addf %90, %92 : vector<16x384xf32>
    %c0_37 = arith.constant 0 : index
    %c0_38 = arith.constant 0 : index
    %94 = vector.load %arg15[%c0_37, %c0_38] : memref<16x384xf32, #tpu.memory_space<vmem>>, vector<16x384xf32>
    tpu.vector_store %arg15[%c0_37, %c0_38], %93 {strides = array<i32>} : memref<16x384xf32, #tpu.memory_space<vmem>>, vector<16x384xf32>,
    %c0_39 = arith.constant 0 : index
    %c0_40 = arith.constant 0 : index
    %95 = vector.load %arg8[%c0_39, %c0_40] : memref<128x384xbf16, #tpu.memory_space<vmem>>, vector<128x384xbf16>
    %c0_41 = arith.constant 0 : index
    %c0_42 = arith.constant 0 : index
    %96 = vector.load %arg10[%c0_41, %c0_42] : memref<1x128xf32, #tpu.memory_space<vmem>>, vector<1x128xf32>
    %97 = vector.shape_cast %96 : vector<1x128xf32> to vector<1x128xf32>
    %98 = vector.broadcast %97 : vector<1x128xf32> to vector<8x128xf32>
    %c1 = arith.constant 1 : index
    %c0_43 = arith.constant 0 : index
    %c0_44 = arith.constant 0 : index
    %99 = vector.load %arg2[%c1, %c0_43, %c0_44] : memref<2x8x128xf32, #tpu.memory_space<vmem>>, vector<1x8x128xf32>
    %100 = vector.shape_cast %99 : vector<1x8x128xf32> to vector<8x128xf32>
    %c0_i32_45 = arith.constant 0 : i32
    %c8_i32_46 = arith.constant 8 : i32
    %101 = arith.muli %c0_i32_45, %c8_i32_46 : i32
    %102 = tpu.assume_multiple %101, 8 : i32
    %103 = arith.index_cast %102 : i32 to index
    %c0_47 = arith.constant 0 : index
    %104 = vector.load %arg15[%103, %c0_47] : memref<16x384xf32, #tpu.memory_space<vmem>>, vector<8x384xf32>
    %105 = arith.truncf %100 : vector<8x128xf32> to vector<8x128xbf16>
    %cst_48 = arith.constant dense<0.000000e+00> : vector<8x384xf32>
    %106 = tpu.matmul %105, %95, %cst_48 {dimension_numbers = #tpu.dot_dimension_numbers<[1], [0], [0], [1], [0, 0, 1, 1], [], []>} : vector<8x128xbf16>, vector<128x384xbf16>, vector<8x384xf32> -> vector<8x384xf32>
    %107 = vector.extract_strided_slice %104 {offsets = [0, 0], sizes = [8, 128], strides = [1, 1]} : vector<8x384xf32> to vector<8x128xf32>
    %108 = vector.extract_strided_slice %106 {offsets = [0, 0], sizes = [8, 128], strides = [1, 1]} : vector<8x384xf32> to vector<8x128xf32>
    %109 = arith.addf %107, %108 : vector<8x128xf32>
    %110 = arith.negf %109 : vector<8x128xf32>
    %111 = math.exp %110 : vector<8x128xf32>
    %cst_49 = arith.constant 1.000000e+00 : f32
    %112 = vector.broadcast %cst_49 : f32 to vector<8x128xf32>
    %113 = arith.addf %112, %111 : vector<8x128xf32>
    %114 = arith.divf %112, %113 : vector<8x128xf32>
    %115 = vector.extract_strided_slice %104 {offsets = [0, 128], sizes = [8, 128], strides = [1, 1]} : vector<8x384xf32> to vector<8x128xf32>
    %116 = vector.extract_strided_slice %106 {offsets = [0, 128], sizes = [8, 128], strides = [1, 1]} : vector<8x384xf32> to vector<8x128xf32>
    %117 = arith.addf %115, %116 : vector<8x128xf32>
    %118 = arith.negf %117 : vector<8x128xf32>
    %119 = math.exp %118 : vector<8x128xf32>
    %cst_50 = arith.constant 1.000000e+00 : f32
    %120 = vector.broadcast %cst_50 : f32 to vector<8x128xf32>
    %121 = arith.addf %120, %119 : vector<8x128xf32>
    %122 = arith.divf %120, %121 : vector<8x128xf32>
    %123 = vector.extract_strided_slice %104 {offsets = [0, 256], sizes = [8, 128], strides = [1, 1]} : vector<8x384xf32> to vector<8x128xf32>
    %124 = vector.extract_strided_slice %106 {offsets = [0, 256], sizes = [8, 128], strides = [1, 1]} : vector<8x384xf32> to vector<8x128xf32>
    %125 = arith.addf %124, %98 : vector<8x128xf32>
    %126 = arith.mulf %114, %125 : vector<8x128xf32>
    %127 = arith.addf %123, %126 : vector<8x128xf32>
    %128 = math.tanh %127 : vector<8x128xf32>
    %cst_51 = arith.constant 1.000000e+00 : f32
    %129 = vector.broadcast %cst_51 : f32 to vector<8x128xf32>
    %130 = arith.subf %129, %122 : vector<8x128xf32>
    %131 = arith.mulf %130, %128 : vector<8x128xf32>
    %132 = arith.mulf %122, %100 : vector<8x128xf32>
    %133 = arith.addf %131, %132 : vector<8x128xf32>
    %c0_i32_52 = arith.constant 0 : i32
    %134 = arith.cmpi eq, %c0_i32_45, %c0_i32_52 : i32
    %135 = arith.extui %134 : i1 to i32
    %c0_i32_53 = arith.constant 0 : i32
    %136 = arith.cmpi ne, %135, %c0_i32_53 : i32
    scf.if %136 {
      %c0_78 = arith.constant 0 : index
      %c0_79 = arith.constant 0 : index
      %194 = vector.load %arg16[%c0_78, %c0_79] : memref<16x128xf32, #tpu.memory_space<vmem>>, vector<8x128xf32>
      tpu.vector_store %arg16[%c0_78, %c0_79], %133 {strides = array<i32>} : memref<16x128xf32, #tpu.memory_space<vmem>>, vector<8x128xf32>,
    } else {
    }
    %c1_i32_54 = arith.constant 1 : i32
    %c8_i32_55 = arith.constant 8 : i32
    %137 = arith.muli %c1_i32_54, %c8_i32_55 : i32
    %138 = tpu.assume_multiple %137, 8 : i32
    %139 = arith.index_cast %138 : i32 to index
    %c0_56 = arith.constant 0 : index
    %140 = vector.load %arg15[%139, %c0_56] : memref<16x384xf32, #tpu.memory_space<vmem>>, vector<8x384xf32>
    %141 = arith.truncf %133 : vector<8x128xf32> to vector<8x128xbf16>
    %cst_57 = arith.constant dense<0.000000e+00> : vector<8x384xf32>
    %142 = tpu.matmul %141, %95, %cst_57 {dimension_numbers = #tpu.dot_dimension_numbers<[1], [0], [0], [1], [0, 0, 1, 1], [], []>} : vector<8x128xbf16>, vector<128x384xbf16>, vector<8x384xf32> -> vector<8x384xf32>
    %143 = vector.extract_strided_slice %140 {offsets = [0, 0], sizes = [8, 128], strides = [1, 1]} : vector<8x384xf32> to vector<8x128xf32>
    %144 = vector.extract_strided_slice %142 {offsets = [0, 0], sizes = [8, 128], strides = [1, 1]} : vector<8x384xf32> to vector<8x128xf32>
    %145 = arith.addf %143, %144 : vector<8x128xf32>
    %146 = arith.negf %145 : vector<8x128xf32>
    %147 = math.exp %146 : vector<8x128xf32>
    %cst_58 = arith.constant 1.000000e+00 : f32
    %148 = vector.broadcast %cst_58 : f32 to vector<8x128xf32>
    %149 = arith.addf %148, %147 : vector<8x128xf32>
    %150 = arith.divf %148, %149 : vector<8x128xf32>
    %151 = vector.extract_strided_slice %140 {offsets = [0, 128], sizes = [8, 128], strides = [1, 1]} : vector<8x384xf32> to vector<8x128xf32>
    %152 = vector.extract_strided_slice %142 {offsets = [0, 128], sizes = [8, 128], strides = [1, 1]} : vector<8x384xf32> to vector<8x128xf32>
    %153 = arith.addf %151, %152 : vector<8x128xf32>
    %154 = arith.negf %153 : vector<8x128xf32>
    %155 = math.exp %154 : vector<8x128xf32>
    %cst_59 = arith.constant 1.000000e+00 : f32
    %156 = vector.broadcast %cst_59 : f32 to vector<8x128xf32>
    %157 = arith.addf %156, %155 : vector<8x128xf32>
    %158 = arith.divf %156, %157 : vector<8x128xf32>
    %159 = vector.extract_strided_slice %140 {offsets = [0, 256], sizes = [8, 128], strides = [1, 1]} : vector<8x384xf32> to vector<8x128xf32>
    %160 = vector.extract_strided_slice %142 {offsets = [0, 256], sizes = [8, 128], strides = [1, 1]} : vector<8x384xf32> to vector<8x128xf32>
    %161 = arith.addf %160, %98 : vector<8x128xf32>
    %162 = arith.mulf %150, %161 : vector<8x128xf32>
    %163 = arith.addf %159, %162 : vector<8x128xf32>
    %164 = math.tanh %163 : vector<8x128xf32>
    %cst_60 = arith.constant 1.000000e+00 : f32
    %165 = vector.broadcast %cst_60 : f32 to vector<8x128xf32>
    %166 = arith.subf %165, %158 : vector<8x128xf32>
    %167 = arith.mulf %166, %164 : vector<8x128xf32>
    %168 = arith.mulf %158, %133 : vector<8x128xf32>
    %169 = arith.addf %167, %168 : vector<8x128xf32>
    %c0_i32_61 = arith.constant 0 : i32
    %170 = arith.cmpi eq, %c1_i32_54, %c0_i32_61 : i32
    %171 = arith.extui %170 : i1 to i32
    %c0_i32_62 = arith.constant 0 : i32
    %172 = arith.cmpi ne, %171, %c0_i32_62 : i32
    scf.if %172 {
      %c0_78 = arith.constant 0 : index
      %c0_79 = arith.constant 0 : index
      %194 = vector.load %arg16[%c0_78, %c0_79] : memref<16x128xf32, #tpu.memory_space<vmem>>, vector<8x128xf32>
      tpu.vector_store %arg16[%c0_78, %c0_79], %169 {strides = array<i32>} : memref<16x128xf32, #tpu.memory_space<vmem>>, vector<8x128xf32>,
    } else {
    }
    %c2_i32_63 = arith.constant 2 : i32
    %c1_64 = arith.constant 1 : index
    %c0_65 = arith.constant 0 : index
    %c0_66 = arith.constant 0 : index
    %173 = vector.load %arg14[%c1_64, %c0_65, %c0_66] : memref<2x8x128xf32, #tpu.memory_space<vmem>>, vector<1x8x128xf32>
    %174 = vector.shape_cast %173 : vector<1x8x128xf32> to vector<8x128xf32>
    %175 = vector.shape_cast %169 : vector<8x128xf32> to vector<1x8x128xf32>
    tpu.vector_store %arg14[%c1_64, %c0_65, %c0_66], %175 {strides = array<i32>} : memref<2x8x128xf32, #tpu.memory_space<vmem>>, vector<1x8x128xf32>,
    %c0_67 = arith.constant 0 : index
    %c0_68 = arith.constant 0 : index
    %176 = vector.load %arg16[%c0_67, %c0_68] : memref<16x128xf32, #tpu.memory_space<vmem>>, vector<8x128xf32>
    %177 = arith.truncf %176 : vector<8x128xf32> to vector<8x128xbf16>
    %c0_69 = arith.constant 0 : index
    %c0_70 = arith.constant 0 : index
    %178 = vector.load %arg11[%c0_69, %c0_70] : memref<128x128xbf16, #tpu.memory_space<vmem>>, vector<128x128xbf16>
    %cst_71 = arith.constant dense<0.000000e+00> : vector<8x128xf32>
    %179 = tpu.matmul %177, %178, %cst_71 {dimension_numbers = #tpu.dot_dimension_numbers<[1], [0], [0], [1], [0, 0, 1, 1], [], []>} : vector<8x128xbf16>, vector<128x128xbf16>, vector<8x128xf32> -> vector<8x128xf32>
    %c0_72 = arith.constant 0 : index
    %c0_73 = arith.constant 0 : index
    %180 = vector.load %arg12[%c0_72, %c0_73] : memref<1x128xf32, #tpu.memory_space<vmem>>, vector<1x128xf32>
    %181 = vector.broadcast %180 : vector<1x128xf32> to vector<8x128xf32>
    %182 = arith.addf %179, %181 : vector<8x128xf32>
    %cst_74 = arith.constant dense<0xFF800000> : vector<8xf32>
    %183 = vector.multi_reduction <maximumf>, %182, %cst_74 [1] : vector<8x128xf32> to vector<8xf32>
    %184 = vector.shape_cast %183 : vector<8xf32> to vector<8x1xf32>
    %185 = vector.broadcast %184 : vector<8x1xf32> to vector<8x128xf32>
    %186 = arith.subf %182, %185 : vector<8x128xf32>
    %187 = math.exp %186 : vector<8x128xf32>
    %cst_75 = arith.constant dense<0.000000e+00> : vector<8xf32>
    %188 = vector.multi_reduction <add>, %187, %cst_75 [1] : vector<8x128xf32> to vector<8xf32>
    %189 = vector.shape_cast %188 : vector<8xf32> to vector<8x1xf32>
    %190 = math.log %189 : vector<8x1xf32>
    %191 = vector.broadcast %190 : vector<8x1xf32> to vector<8x128xf32>
    %192 = arith.subf %186, %191 : vector<8x128xf32>
    %c0_76 = arith.constant 0 : index
    %c0_77 = arith.constant 0 : index
    %193 = vector.load %arg13[%c0_76, %c0_77] : memref<8x128xf32, #tpu.memory_space<vmem>>, vector<8x128xf32>
    tpu.vector_store %arg13[%c0_76, %c0_77], %192 {strides = array<i32>} : memref<8x128xf32, #tpu.memory_space<vmem>>, vector<8x128xf32>,
    return
  }
  func.func @transform_0(%arg0: i32) -> (i32, i32) {
    %c0_i32 = arith.constant 0 : i32
    %c0_i32_0 = arith.constant 0 : i32
    %c0_i32_1 = arith.constant 0 : i32
    return %c0_i32, %c0_i32_0 : i32, i32
  }
  func.func @transform_1(%arg0: i32) -> (i32, i32, i32) {
    %c0_i32 = arith.constant 0 : i32
    %c0_i32_0 = arith.constant 0 : i32
    %c0_i32_1 = arith.constant 0 : i32
    %c0_i32_2 = arith.constant 0 : i32
    return %c0_i32, %c0_i32_0, %c0_i32_1 : i32, i32, i32
  }
  func.func @transform_2(%arg0: i32) -> (i32, i32) {
    %c0_i32 = arith.constant 0 : i32
    %c0_i32_0 = arith.constant 0 : i32
    %c0_i32_1 = arith.constant 0 : i32
    return %c0_i32, %c0_i32_0 : i32, i32
  }
  func.func @transform_3(%arg0: i32) -> (i32, i32) {
    %c0_i32 = arith.constant 0 : i32
    %c0_i32_0 = arith.constant 0 : i32
    %c0_i32_1 = arith.constant 0 : i32
    return %c0_i32, %c0_i32_0 : i32, i32
  }
  func.func @transform_4(%arg0: i32) -> (i32, i32) {
    %c0_i32 = arith.constant 0 : i32
    %c0_i32_0 = arith.constant 0 : i32
    %c0_i32_1 = arith.constant 0 : i32
    return %c0_i32, %c0_i32_0 : i32, i32
  }
  func.func @transform_5(%arg0: i32) -> (i32, i32) {
    %c0_i32 = arith.constant 0 : i32
    %c0_i32_0 = arith.constant 0 : i32
    %c0_i32_1 = arith.constant 0 : i32
    return %c0_i32, %c0_i32_0 : i32, i32
  }
  func.func @transform_6(%arg0: i32) -> (i32, i32) {
    %c0_i32 = arith.constant 0 : i32
    %c0_i32_0 = arith.constant 0 : i32
    %c0_i32_1 = arith.constant 0 : i32
    return %c0_i32, %c0_i32_0 : i32, i32
  }
  func.func @transform_7(%arg0: i32) -> (i32, i32) {
    %c0_i32 = arith.constant 0 : i32
    %c0_i32_0 = arith.constant 0 : i32
    %c0_i32_1 = arith.constant 0 : i32
    return %c0_i32, %c0_i32_0 : i32, i32
  }
  func.func @transform_8(%arg0: i32) -> (i32, i32) {
    %c0_i32 = arith.constant 0 : i32
    %c0_i32_0 = arith.constant 0 : i32
    %c0_i32_1 = arith.constant 0 : i32
    return %c0_i32, %c0_i32_0 : i32, i32
  }
  func.func @transform_9(%arg0: i32) -> (i32, i32) {
    %c0_i32 = arith.constant 0 : i32
    %c0_i32_0 = arith.constant 0 : i32
    %c0_i32_1 = arith.constant 0 : i32
    return %c0_i32, %c0_i32_0 : i32, i32
  }
  func.func @transform_10(%arg0: i32) -> (i32, i32) {
    %c0_i32 = arith.constant 0 : i32
    %c0_i32_0 = arith.constant 0 : i32
    %c0_i32_1 = arith.constant 0 : i32
    return %c0_i32, %c0_i32_0 : i32, i32
  }
  func.func @transform_11(%arg0: i32) -> (i32, i32) {
    %c0_i32 = arith.constant 0 : i32
    %c0_i32_0 = arith.constant 0 : i32
    %c0_i32_1 = arith.constant 0 : i32
    return %c0_i32, %c0_i32_0 : i32, i32
  }
  func.func @transform_12(%arg0: i32) -> (i32, i32) {
    %c0_i32 = arith.constant 0 : i32
    %c0_i32_0 = arith.constant 0 : i32
    %c0_i32_1 = arith.constant 0 : i32
    return %c0_i32, %c0_i32_0 : i32, i32
  }
  func.func @transform_13(%arg0: i32) -> (i32, i32, i32) {
    %c0_i32 = arith.constant 0 : i32
    %c0_i32_0 = arith.constant 0 : i32
    %c0_i32_1 = arith.constant 0 : i32
    %c0_i32_2 = arith.constant 0 : i32
    return %c0_i32, %c0_i32_0, %c0_i32_1 : i32, i32, i32
  }
}

</mosaic_0001>

<bundles_post_ra>
// kernel: decoder_forward.1
= control target key start
LH: loop header
LB: loop body
LE: loop exit
PB: predicated region body
PF: predicated region fallthrough
CT: control target
= control target key end

     0   :  { %19 = vsyncpa [#allocation5], 0  ;;  %s2505_s0 = inlined_call_operand.vmem [shape: f32[16,128], index: 0, kind: input, shape index: {}]   ;;  %s2506_s1 = inlined_call_operand.vmem [shape: f32[2,8,128], index: 1, kind: input, shape index: {}, may-alias: {1,13}]   ;;  %s2507_s2 = inlined_call_operand.vmem [shape: bf16[128,384], index: 2, kind: input, shape index: {}]   ;;  %s2508_s3 = inlined_call_operand.hbm [shape: bf16[128,384], index: 3, kind: input, shape index: {}]   ;;  %s2509_s4 = inlined_call_operand.vmem [shape: f32[1,384], index: 4, kind: input, shape index: {}]   ;;  %s2510_s5 = inlined_call_operand.vmem [shape: f32[1,128], index: 5, kind: input, shape index: {}]   ;;  %s2511_s6 = inlined_call_operand.hbm [shape: bf16[128,384], index: 6, kind: input, shape index: {}]   ;;  %s2512_s7 = inlined_call_operand.hbm [shape: bf16[128,384], index: 7, kind: input, shape index: {}]   ;;  %s2513_s8 = inlined_call_operand.vmem [shape: f32[1,384], index: 8, kind: input, shape index: {}]   ;;  %s2514_s9 = inlined_call_operand.vmem [shape: f32[1,128], index: 9, kind: input, shape index: {}]   ;;  %s2515_s10 = inlined_call_operand.vmem [shape: bf16[128,128], index: 10, kind: input, shape index: {}]   ;;  %s2516_s11 = inlined_call_operand.vmem [shape: f32[1,128], index: 11, kind: input, shape index: {}]   ;;  %s2517_s12 = inlined_call_operand.vmem [shape: f32[8,128], index: 12, kind: output, shape index: {0}]   ;;  %s2518_s13 = inlined_call_operand.vmem [shape: f32[2,8,128], index: 13, kind: output, shape index: {1}, may-alias: {1,13}]  }
   0x1   :  { %20 = vsyncpa [#allocation7], 0  ;;  %s2110_s25 = smov [#allocation6]   ;;  %s2111_s27 = smov [#allocation4]  }
   0x2   :  { %s48_s26 = sshll.u32 %s2110_s25, 4  ;;  %s32_s28 = sshll.u32 %s2111_s27, 4  ;;  %s49_s26 = int_to_ptr.vmem [resolvable:$true] %s48_s26  ;;  %s33_s28 = int_to_ptr.vmem [resolvable:$true] %s32_s28 }
   0x3   :  { %s2054_s29 = scalar_lea.vmem %s49_s26, 3072  ;;  %p2059_p1 = scmp.lt.s32.totalorder %s49_s26, %s49_s26 }
   0x4   :  { %p2055_p0 = scmp.ne.s32.totalorder %s49_s26, %s2054_s29  ;;  %p2060_p2 = scmp.lt.s32.totalorder %s2054_s29, %s2054_s29 }
   0x6   :  { %p2061_p3 = por %p2060_p2, %p2059_p1 }
   0x8   :  { %p2062_p4 = pnand %p2061_p3, %p2055_p0 }
   0xa   :  { %2065 = shalt.err (!%p2062_p4)
}
   0xb   :  { %s2112_s30 = smov 192   ;;  %s2113_s14 = smov 12  }
   0xc   :  { %54 = dma.hbm_to_vmem [thread:$0]  %s2511_s6, 3072, %s49_s26, [#allocation7], %s2112_s30, %s2112_s30, %s2113_s14  }
   0xd   :  { %s2074_s17 = scalar_lea.vmem %s33_s28, 3072  ;;  %p2079_p6 = scmp.lt.s32.totalorder %s33_s28, %s33_s28 }
   0xe   :  { %p2075_p5 = scmp.ne.s32.totalorder %s33_s28, %s2074_s17  ;;  %p2080_p7 = scmp.lt.s32.totalorder %s2074_s17, %s2074_s17 }
  0x10   :  { %p2081_p8 = por %p2080_p7, %p2079_p6 }
  0x12   :  { %p2082_p9 = pnand %p2081_p8, %p2075_p5 }
  0x14   :  { %2085 = shalt.err (!%p2082_p9)
}
  0x15   :  { %38 = dma.hbm_to_vmem [thread:$0]  %s2508_s3, 3072, %s33_s28, [#allocation5], %s2112_s30, %s2112_s30, %s2113_s14  }
  0x16   :  { %s2114_s20 = smov [#allocation8]  }
  0x17   :  { %s60_s21 = sshll.u32 %s2114_s20, 4  ;;  %s61_s21 = int_to_ptr.vmem [resolvable:$true] %s60_s21 }
  0x18   :  { %s2094_s22 = scalar_lea.vmem %s61_s21, 3072  ;;  %p2099_p11 = scmp.lt.s32.totalorder %s61_s21, %s61_s21 }
  0x19   :  { %p2095_p10 = scmp.ne.s32.totalorder %s61_s21, %s2094_s22  ;;  %p2100_p12 = scmp.lt.s32.totalorder %s2094_s22, %s2094_s22 }
  0x1b   :  { %p2101_p13 = por %p2100_p12, %p2099_p11 }
  0x1d   :  { %p2102_p0 = pnand %p2101_p13, %p2095_p10 }
  0x1f   :  { %2105 = shalt.err (!%p2102_p0)
}
  0x20   :  { %66 = dma.hbm_to_vmem [thread:$0]  %s2512_s7, 3072, %s61_s21, [#allocation7], %s2112_s30, %s2112_s30, %s2113_s14  }
  0x21   :  { %2106 = dma.done.wait [#allocation5], 3072  }
  0x22   :  { %2107 = vsyncadd [#allocation5], 4294964224 }
  0x23   :  { %2108 = dma.done.wait [#allocation7], 6144  }
  0x24   :  { %2109 = vsyncadd [#allocation7], 4294961152  ;;  %v2115_v0 = vmov 0.0   ;;  %v2116_v1 = vmov 0   ;;  %vm2117_vm0 = vmmov 0   ;;  %v85_v23 = vld [vmem:[%s2505_s0] sm:$0xff]  ;;  %v122_v55 = vlaneseq }
  0x25   :  { %1718 = vmatprep.subr.bf16.mxu1 %v2115_v0  ;;  %297 = vmatprep.mubr.bf16.mxu0 %v2116_v1  ;;  %v1866_v2 = vld [vmem:[%s2507_s2 + $0xac] ss:$12 sps:$4 sm:$0xff]   ;;  %v1868_v3 = vld [vmem:[%s2507_s2 + $0xa8] ss:$12 sps:$4 sm:$0xff]   ;;  %v1871_v5 = vld [vmem:[%s2507_s2 + $0x90] ss:$12 sps:$4 sm:$0xff]  }
  0x26   :  { %1734 = vmatprep.mubr.msk.bf16.mxu1 %vm2117_vm0, %v2115_v0  ;;  %265 = vmatprep.subr.bf16.mxu0 %v1866_v2  ;;  %v1869_v4 = vld [vmem:[%s2507_s2 + $0x94] ss:$12 sps:$4 sm:$0xff]   ;;  %v1872_v6 = vld [vmem:[%s2507_s2 + $0x7c] ss:$12 sps:$4 sm:$0xff]   ;;  %v1874_v7 = vld [vmem:[%s2507_s2 + $0x78] ss:$12 sps:$4 sm:$0xff]  }
  0x27   :  { %266 = vmatpush1.bf16.msra.mxu0 %v1868_v3  ;;  %v1875_v8 = vld [vmem:[%s2507_s2 + $0x64] ss:$12 sps:$4 sm:$0xff]   ;;  %v1877_v10 = vld [vmem:[%s2507_s2 + $0x60] ss:$12 sps:$4 sm:$0xff]   ;;  %v1880_v13 = vld [vmem:[%s2507_s2 + $0x48] ss:$12 sps:$4 sm:$0xff]  }
  0x28   :  { %267 = vmatprep.subr.bf16.mxu0 %v1869_v4  ;;  %v1887_v9 = vld [vmem:[%s2507_s2 + $0xb0] ss:$12 sps:$4 sm:$0xff]   ;;  %v1878_v11 = vld [vmem:[%s2507_s2 + $0x4c] ss:$12 sps:$4 sm:$0xff]   ;;  %v1881_v14 = vld [vmem:[%s2507_s2 + $0x34] ss:$12 sps:$4 sm:$0xff]  }
  0x29   :  { %1719 = vmatpush3.bf16.msra.mxu1 %v1887_v9  ;;  %v1891_v12 = vld [vmem:[%s2507_s2 + $0x98] ss:$12 sps:$4 sm:$0xff]   ;;  %v1895_v15 = vld [vmem:[%s2507_s2 + $0x80] ss:$12 sps:$4 sm:$0xff]   ;;  %v1883_v16 = vld [vmem:[%s2507_s2 + $0x30] ss:$12 sps:$4 sm:$0xff]  }
  0x2a   :  { %1720 = vmatprep.subr.bf16.mxu1 %v2115_v0  ;;  %v1884_v17 = vld [vmem:[%s2507_s2 + $0x1c] ss:$12 sps:$4 sm:$0xff]   ;;  %v1886_v19 = vld [vmem:[%s2507_s2 + $0x18] ss:$12 sps:$4 sm:$0xff]   ;;  %v1890_v22 = vld [vmem:[%s2507_s2] ss:$12 sps:$4 sm:$0xff]  }
  0x2b   :  { %268 = vmatpush1.bf16.msra.mxu0 %v1871_v5  ;;  %v1899_v18 = vld [vmem:[%s2507_s2 + $0x68] ss:$12 sps:$4 sm:$0xff]   ;;  %v1888_v20 = vld [vmem:[%s2507_s2 + $0x4] ss:$12 sps:$4 sm:$0xff]   ;;  %v2274_v25 = vld [vmem:[#allocation4 + $0xac] ss:$12 sps:$4 sm:$0xff]  }
  0x2c   :  { %269 = vmatprep.subr.bf16.mxu0 %v1872_v6  ;;  %v1903_v21 = vld [vmem:[%s2507_s2 + $0x50] ss:$12 sps:$4 sm:$0xff]   ;;  %v86_v24 = vld [vmem:[%s2505_s0 + $0x8] sm:$0xff]  ;;  %v1907_v26 = vld [vmem:[%s2507_s2 + $0x38] ss:$12 sps:$4 sm:$0xff]   ;;  %v2336_v56 = vshrl.u32 %v122_v55, 7 }
  0x2d   :  { %1721 = vmatpush3.bf16.msra.mxu1 %v1891_v12  ;;  %v87_v27 = vpack.c.bf16 %v86_v24, %v85_v23  ;;  %v2280_v28 = vld [vmem:[#allocation4 + $0xa8] ss:$12 sps:$4 sm:$0xff]   ;;  %v1911_v30 = vld [vmem:[%s2507_s2 + $0x20] ss:$12 sps:$4 sm:$0xff]   ;;  %v2289_v31 = vld [vmem:[#allocation4 + $0x90] ss:$12 sps:$4 sm:$0xff]  }
  0x2e   :  { %1722 = vmatprep.subr.bf16.mxu1 %v2115_v0  ;;  %v2282_v29 = vld [vmem:[#allocation4 + $0x94] ss:$12 sps:$4 sm:$0xff]   ;;  %v2292_v32 = vld [vmem:[#allocation4 + $0x7c] ss:$12 sps:$4 sm:$0xff]   ;;  %v1900_v34 = vld [vmem:[#allocation4 + $0x78] ss:$12 sps:$4 sm:$0xff]  }
  0x2f   :  { %270 = vmatpush1.bf16.msra.mxu0 %v1874_v7  ;;  %v1915_v33 = vld [vmem:[%s2507_s2 + $0x8] ss:$12 sps:$4 sm:$0xff]   ;;  %v1906_v35 = vld [vmem:[#allocation4 + $0x64] ss:$12 sps:$4 sm:$0xff]   ;;  %v1904_v37 = vld [vmem:[#allocation4 + $0x60] ss:$12 sps:$4 sm:$0xff]  }
  0x30   :  { %271 = vmatprep.subr.bf16.mxu0 %v1875_v8  ;;  %v1919_v36 = vld [vmem:[#allocation4 + $0xb0] ss:$12 sps:$4 sm:$0xff]   ;;  %v1910_v38 = vld [vmem:[#allocation4 + $0x4c] ss:$12 sps:$4 sm:$0xff]   ;;  %v1908_v40 = vld [vmem:[#allocation4 + $0x48] ss:$12 sps:$4 sm:$0xff]  }
  0x31   :  { %1723 = vmatpush3.bf16.msra.mxu1 %v1895_v15  ;;  %v1923_v39 = vld [vmem:[#allocation4 + $0x98] ss:$12 sps:$4 sm:$0xff]   ;;  %v1914_v41 = vld [vmem:[#allocation4 + $0x34] ss:$12 sps:$4 sm:$0xff]   ;;  %v1912_v43 = vld [vmem:[#allocation4 + $0x30] ss:$12 sps:$4 sm:$0xff]  }
  0x32   :  { %1724 = vmatprep.subr.bf16.mxu1 %v2115_v0  ;;  %v1924_v42 = vld [vmem:[#allocation4 + $0x80] ss:$12 sps:$4 sm:$0xff]   ;;  %v1918_v44 = vld [vmem:[#allocation4 + $0x1c] ss:$12 sps:$4 sm:$0xff]   ;;  %v1916_v46 = vld [vmem:[#allocation4 + $0x18] ss:$12 sps:$4 sm:$0xff]  }
  0x33   :  { %272 = vmatpush1.bf16.msra.mxu0 %v1877_v10  ;;  %v1925_v45 = vld [vmem:[#allocation4 + $0x68] ss:$12 sps:$4 sm:$0xff]   ;;  %v1922_v47 = vld [vmem:[#allocation4 + $0x4] ss:$12 sps:$4 sm:$0xff]   ;;  %v1920_v49 = vld [vmem:[#allocation4] ss:$12 sps:$4 sm:$0xff]  }
  0x34   :  { %273 = vmatprep.subr.bf16.mxu0 %v1878_v11  ;;  %v1926_v48 = vld [vmem:[#allocation4 + $0x50] ss:$12 sps:$4 sm:$0xff]   ;;  %v2311_v50 = vld [vmem:[%s2506_s1] sm:$0xff]  ;;  %v1929_v54 = vld [vmem:[#allocation4 + $0x8] ss:$12 sps:$4 sm:$0xff]   ;;  %v124_v57 = vsub.s32 0, %v2336_v56 }
  0x35   :  { %1725 = vmatpush3.bf16.msra.mxu1 %v1899_v18  ;;  %v1927_v51 = vld [vmem:[#allocation4 + $0x38] ss:$12 sps:$4 sm:$0xff]   ;;  %v401_v52 = vpack.c.bf16 %v2311_v50, %v2311_v50  ;;  %v1928_v53 = vld [vmem:[#allocation4 + $0x20] ss:$12 sps:$4 sm:$0xff]   ;;  %v128_v60 = vsub.s32 1, %v2336_v56  ;;  %v132_v5 = vsub.s32 2, %v2336_v56 }
  0x36   :  { %1726 = vmatprep.subr.bf16.mxu1 %v2115_v0  ;;  %v120_v58 = vld [vmem:[%s2509_s4] sm:$0x7]  ;;  %v1945_v55 = vld [vmem:[#allocation6 + $0x68] ss:$12 sps:$4 sm:$0xff]  }
  0x37   :  { %274 = vmatpush1.bf16.msra.mxu0 %v1880_v13  ;;  %v125_v62 = vrot.slane %v120_v58, %v124_v57  ;;  %v129_v2 = vrot.slane %v120_v58, %v128_v60  ;;  %v133_v8 = vrot.slane %v120_v58, %v132_v5  ;;  %v1946_v58 = vld [vmem:[#allocation6 + $0x48] ss:$12 sps:$4 sm:$0xff]  }
  0x38   :  { %275 = vmatprep.subr.bf16.mxu0 %v1881_v14 }
  0x39   :  { %1727 = vmatpush3.bf16.msra.mxu1 %v1903_v21 }
  0x3a   :  { %1728 = vmatprep.subr.bf16.mxu1 %v2115_v0 }
  0x3b   :  { %276 = vmatpush1.bf16.msra.mxu0 %v1883_v16 }
  0x3c   :  { %277 = vmatprep.subr.bf16.mxu0 %v1884_v17 }
  0x3d   :  { %1729 = vmatpush3.bf16.msra.mxu1 %v1907_v26 }
  0x3e   :  { %1730 = vmatprep.subr.bf16.mxu1 %v2115_v0 }
  0x3f   :  { %278 = vmatpush1.bf16.msra.mxu0 %v1886_v19 }
  0x40   :  { %279 = vmatprep.subr.bf16.mxu0 %v1888_v20 }
  0x41   :  { %1731 = vmatpush3.bf16.msra.mxu1 %v1911_v30  ;;  %v2359_v30 = vld [vmem:[%s2510_s5] ss:$0 sm:$0xff] }
  0x42   :  { %1732 = vmatprep.subr.bf16.mxu1 %v2115_v0 }
  0x43   :  { %280 = vmatpush1.bf16.msra.mxu0 %v1890_v22 }
  0x44   :  { %530 = vmatprep.subr.bf16.mxu0 %v2274_v25 }
  0x45   :  { %1733 = vmatpush3.bf16.msra.mxu1 %v1915_v33 }
  0x46   :  { %298 = vmatmul.mubr.bf16.vlgmr.msra.gmra.mxu0 %v87_v27  ;;  %1738 = vmatprep.subr.bf16.mxu1 %v2115_v0 }
  0x47   :  { %531 = vmatpush1.bf16.msra.mxu0 %v2280_v28  ;;  %562 = vmatprep.mubr.bf16.mxu0 %v2116_v1 }
  0x48   :  { %532 = vmatprep.subr.bf16.mxu0 %v2282_v29  ;;  %1735 = vmatmul.mubr.bf16.vlgmr.msra.gmra.mxu1 %v87_v27 }
  0x49   :  { %1739 = vmatpush3.bf16.msra.mxu1 %v1919_v36  ;;  %1754 = vmatprep.mubr.msk.bf16.mxu1 %vm2117_vm0, %v2115_v0 }
  0x4a   :  { %1740 = vmatprep.subr.bf16.mxu1 %v2115_v0 }
  0x4b   :  { %533 = vmatpush1.bf16.msra.mxu0 %v2289_v31 }
  0x4c   :  { %534 = vmatprep.subr.bf16.mxu0 %v2292_v32 }
  0x4d   :  { %1741 = vmatpush3.bf16.msra.mxu1 %v1923_v39 }
  0x4e   :  { %1742 = vmatprep.subr.bf16.mxu1 %v2115_v0 }
  0x4f   :  { %535 = vmatpush1.bf16.msra.mxu0 %v1900_v34 }
  0x50   :  { %536 = vmatprep.subr.bf16.mxu0 %v1906_v35 }
  0x51   :  { %1743 = vmatpush3.bf16.msra.mxu1 %v1924_v42 }
  0x52   :  { %1744 = vmatprep.subr.bf16.mxu1 %v2115_v0 }
  0x53   :  { %537 = vmatpush1.bf16.msra.mxu0 %v1904_v37 }
  0x54   :  { %538 = vmatprep.subr.bf16.mxu0 %v1910_v38 }
  0x55   :  { %1745 = vmatpush3.bf16.msra.mxu1 %v1925_v45 }
  0x56   :  { %1746 = vmatprep.subr.bf16.mxu1 %v2115_v0 }
  0x57   :  { %539 = vmatpush1.bf16.msra.mxu0 %v1908_v40 }
  0x58   :  { %540 = vmatprep.subr.bf16.mxu0 %v1914_v41 }
  0x59   :  { %1747 = vmatpush3.bf16.msra.mxu1 %v1926_v48 }
  0x5a   :  { %1748 = vmatprep.subr.bf16.mxu1 %v2115_v0 }
  0x5b   :  { %541 = vmatpush1.bf16.msra.mxu0 %v1912_v43 }
  0x5c   :  { %542 = vmatprep.subr.bf16.mxu0 %v1918_v44 }
  0x5d   :  { %1749 = vmatpush3.bf16.msra.mxu1 %v1927_v51 }
  0x5e   :  { %1750 = vmatprep.subr.bf16.mxu1 %v2115_v0 }
  0x5f   :  { %543 = vmatpush1.bf16.msra.mxu0 %v1916_v46 }
  0x60   :  { %544 = vmatprep.subr.bf16.mxu0 %v1922_v47 }
  0x61   :  { %1751 = vmatpush3.bf16.msra.mxu1 %v1928_v53 }
  0x62   :  { %1752 = vmatprep.subr.bf16.mxu1 %v2115_v0 }
  0x63   :  { %545 = vmatpush1.bf16.msra.mxu0 %v1920_v49 }
  0x64   :  { %641 = vmatprep.subr.bf16.mxu0 %v2274_v25 }
  0x65   :  { %1753 = vmatpush3.bf16.msra.mxu1 %v1929_v54 }
  0x66   :  { %563 = vmatmul.mubr.bf16.vlgmr.msra.gmra.mxu0 %v401_v52  ;;  %1758 = vmatprep.subr.bf16.mxu1 %v2115_v0 }
  0x67   :  { %642 = vmatpush1.bf16.msra.mxu0 %v2280_v28  ;;  %673 = vmatprep.mubr.bf16.mxu0 %v2116_v1 }
  0x68   :  { %643 = vmatprep.subr.bf16.mxu0 %v2282_v29  ;;  %1755 = vmatmul.mubr.bf16.vlgmr.msra.gmra.mxu1 %v401_v52  ;;  %v1941_v52 = vld [vmem:[#allocation6 + $0x80] ss:$12 sps:$4 sm:$0xff]  }
  0x69   :  { %1759 = vmatpush3.bf16.msra.mxu1 %v1919_v36  ;;  %1774 = vmatprep.mubr.msk.bf16.mxu1 %vm2117_vm0, %v2115_v0 }
  0x6a   :  { %1760 = vmatprep.subr.bf16.mxu1 %v2115_v0 }
  0x6b   :  { %644 = vmatpush1.bf16.msra.mxu0 %v2289_v31 }
  0x6c   :  { %645 = vmatprep.subr.bf16.mxu0 %v2292_v32 }
  0x6d   :  { %1761 = vmatpush3.bf16.msra.mxu1 %v1923_v39 }
  0x6e   :  { %1762 = vmatprep.subr.bf16.mxu1 %v2115_v0 }
  0x6f   :  { %646 = vmatpush1.bf16.msra.mxu0 %v1900_v34 }
  0x70   :  { %647 = vmatprep.subr.bf16.mxu0 %v1906_v35 }
  0x71   :  { %1763 = vmatpush3.bf16.msra.mxu1 %v1924_v42 }
  0x72   :  { %1764 = vmatprep.subr.bf16.mxu1 %v2115_v0 }
  0x73   :  { %648 = vmatpush1.bf16.msra.mxu0 %v1904_v37 }
  0x74   :  { %649 = vmatprep.subr.bf16.mxu0 %v1910_v38 }
  0x75   :  { %1765 = vmatpush3.bf16.msra.mxu1 %v1925_v45  ;;  %v1930_v45 = vld [vmem:[#allocation6 + $0xa8] ss:$12 sps:$4 sm:$0xff]  }
  0x76   :  { %1766 = vmatprep.subr.bf16.mxu1 %v2115_v0 }
  0x77   :  { %650 = vmatpush1.bf16.msra.mxu0 %v1908_v40 }
  0x78   :  { %651 = vmatprep.subr.bf16.mxu0 %v1914_v41 }
  0x79   :  { %1767 = vmatpush3.bf16.msra.mxu1 %v1926_v48  ;;  %v1934_v48 = vld [vmem:[#allocation6 + $0x90] ss:$12 sps:$4 sm:$0xff]  }
  0x7a   :  { %1768 = vmatprep.subr.bf16.mxu1 %v2115_v0 }
  0x7b   :  { %652 = vmatpush1.bf16.msra.mxu0 %v1912_v43 }
  0x7c   :  { %653 = vmatprep.subr.bf16.mxu0 %v1918_v44  ;;  %v1932_v44 = vld [vmem:[#allocation6 + $0xac] ss:$12 sps:$4 sm:$0xff]  }
  0x7d   :  { %1769 = vmatpush3.bf16.msra.mxu1 %v1927_v51  ;;  %v1938_v51 = vld [vmem:[#allocation6 + $0x78] ss:$12 sps:$4 sm:$0xff]  }
  0x7e   :  { %1770 = vmatprep.subr.bf16.mxu1 %v2115_v0 }
  0x7f   :  { %654 = vmatpush1.bf16.msra.mxu0 %v1916_v46  ;;  %v1933_v46 = vld [vmem:[#allocation6 + $0xb0] ss:$12 sps:$4 sm:$0xff]  }
  0x80   :  { %655 = vmatprep.subr.bf16.mxu0 %v1922_v47  ;;  %v1936_v47 = vld [vmem:[#allocation6 + $0x94] ss:$12 sps:$4 sm:$0xff]  }
  0x81   :  { %1771 = vmatpush3.bf16.msra.mxu1 %v1928_v53  ;;  %v1944_v53 = vld [vmem:[#allocation6 + $0x64] ss:$12 sps:$4 sm:$0xff]  }
  0x82   :  { %1772 = vmatprep.subr.bf16.mxu1 %v2115_v0 }
  0x83   :  { %656 = vmatpush1.bf16.msra.mxu0 %v1920_v49  ;;  %v1937_v49 = vld [vmem:[#allocation6 + $0x98] ss:$12 sps:$4 sm:$0xff]  }
  0x84   :  { %927 = vmatprep.subr.bf16.mxu0 %v1932_v44  ;;  %v1970_v44 = vld [vmem:[#allocation8 + $0x7c] ss:$12 sps:$4 sm:$0xff]  }
  0x85   :  { %1773 = vmatpush3.bf16.msra.mxu1 %v1929_v54  ;;  %v1942_v54 = vld [vmem:[#allocation6 + $0x60] ss:$12 sps:$4 sm:$0xff]  }
  0x86   :  { %1778 = vmatprep.subr.bf16.mxu1 %v2115_v0 }
 0x106   :  { %v299_v59 = vpop.f32.mrf.mxu0 }
 0x107   :  { %v300_v13 = vadd.f32 %v299_v59, %v125_v62  ;;  %v1948_v59 = vld [vmem:[#allocation6 + $0x4c] ss:$12 sps:$4 sm:$0xff]  }
 0x108   :  { %v301_v61 = vpop.f32.mrf.mxu0  ;;  %v342_v7 = vpop.f32.mrf.mxu1 }
 0x109   :  { %v302_v19 = vadd.f32 %v301_v61, %v129_v2  ;;  %v343_v34 = vadd.f32 %v342_v7, %v133_v8  ;;  %v1949_v61 = vld [vmem:[#allocation6 + $0x50] ss:$12 sps:$4 sm:$0xff]   ;;  %v1954_v7 = vld [vmem:[#allocation6 + $0x18] ss:$12 sps:$4 sm:$0xff]  }
 0x10a   :  { %v303_v63 = vpop.f32.mrf.mxu0  ;;  %v1736_v9 = vpop.f32.mrf.mxu1 }
 0x10b   :  { %v2347_v3 = vadd.f32 %v303_v63, %v125_v62  ;;  %v1952_v62 = vld [vmem:[#allocation6 + $0x34] ss:$12 sps:$4 sm:$0xff]   ;;  %v1950_v63 = vld [vmem:[#allocation6 + $0x30] ss:$12 sps:$4 sm:$0xff]  }
 0x10c   :  { %v305_v4 = vpop.f32.mrf.mxu0  ;;  %v345_v10 = vpop.f32.mrf.mxu1  ;;  %v1960_v9 = vld [vmem:[#allocation6 + $0x4] ss:$12 sps:$4 sm:$0xff]  }
 0x10d   :  { %v2350_v6 = vadd.f32 %v305_v4, %v129_v2  ;;  %v2354_v11 = vadd.f32 %v345_v10, %v133_v8  ;;  %v1953_v2 = vld [vmem:[#allocation6 + $0x38] ss:$12 sps:$4 sm:$0xff]   ;;  %v1956_v4 = vld [vmem:[#allocation6 + $0x1c] ss:$12 sps:$4 sm:$0xff]   ;;  %v1957_v8 = vld [vmem:[#allocation6 + $0x20] ss:$12 sps:$4 sm:$0xff]  }
 0x10e   :  { %v1737_v12 = vpop.f32.mrf.mxu1  ;;  %v1958_v10 = vld [vmem:[#allocation6] ss:$12 sps:$4 sm:$0xff]  }
 0x10f   :  { %v1961_v12 = vld [vmem:[#allocation6 + $0x8] ss:$12 sps:$4 sm:$0xff]  }
 0x126   :  { %v564_v14 = vpop.f32.mrf.mxu0 }
 0x127   :  { %v611_v15 = vadd.f32 %v564_v14, %v300_v13  ;;  %v2376_v13 = vld [vmem:[#allocation8 + $0xac] ss:$12 sps:$4 sm:$0xff]  }
 0x128   :  { %v566_v16 = vpop.f32.mrf.mxu0  ;;  %v605_v22 = vpop.f32.mrf.mxu1 }
 0x129   :  { %v1587_v17 = vmul.f32 -1.442695, %v611_v15  ;;  %v618_v21 = vadd.f32 %v566_v16, %v302_v19  ;;  %v625_v32 = vadd.f32 %v2359_v30, %v605_v22 }
 0x12a   :  { %v568_v18 = vpop.f32.mrf.mxu0  ;;  %v1756_v24 = vpop.f32.mrf.mxu1 }
 0x12b   :  { %2002 = vpow2.f32 %v1587_v17  ;;  %v1588_v23 = vmul.f32 -1.442695, %v618_v21 }
 0x12c   :  { %v569_v20 = vpop.f32.mrf.mxu0  ;;  %v608_v25 = vpop.f32.mrf.mxu1 }
 0x12d   :  { %2004 = vpow2.f32 %v1588_v23 }
 0x12e   :  { %v1757_v26 = vpop.f32.mrf.mxu1 }
 0x138   :  { %v2003_v27 = vpop.eup %2002 }
 0x139   :  { %v615_v28 = vadd.f32 1.0, %v2003_v27 }
 0x13a   :  { %v2005_v29 = vpop.eup %2004 }
 0x13b   :  { %2006 = vrcp.f32 %v615_v28  ;;  %v622_v31 = vadd.f32 1.0, %v2005_v29 }
 0x13d   :  { %2008 = vrcp.f32 %v622_v31 }
 0x148   :  { %v2007_v33 = vpop.eup %2006 }
 0x149   :  { %v626_v35 = vmul.f32 %v2007_v33, %v625_v32 }
 0x14a   :  { %v2009_v37 = vpop.eup %2008 }
 0x14b   :  { %v627_v36 = vadd.f32 %v626_v35, %v343_v34  ;;  %v629_v38 = vsub.f32 1.0, %v2009_v37  ;;  %v631_v41 = vmul.f32 %v2009_v37, %v2311_v50  ;;  %v1940_v50 = vld [vmem:[#allocation6 + $0x7c] ss:$12 sps:$4 sm:$0xff]  }
 0x14d   :  { %2010 = vtanh.f32 %v627_v36 }
 0x15a   :  { %v2011_v39 = vpop.eup %2010 }
 0x15b   :  { %v630_v40 = vmul.f32 %v2011_v39, %v629_v38  ;;  %v2386_v39 = vld [vmem:[#allocation8 + $0xa8] ss:$12 sps:$4 sm:$0xff]  }
 0x15d   :  { %v2363_v42 = vadd.f32 %v631_v41, %v630_v40  ;;  %v2388_v40 = vld [vmem:[#allocation8 + $0xb0] ss:$12 sps:$4 sm:$0xff]   ;;  %v1967_v41 = vld [vmem:[#allocation8 + $0x94] ss:$12 sps:$4 sm:$0xff]  }
 0x15f   :  { %v640_v43 = vpack.c.bf16 %v2363_v42, %v2363_v42 }
 0x161   :  { %674 = vmatmul.mubr.bf16.vlgmr.msra.gmra.mxu0 %v640_v43  ;;  %1775 = vmatmul.mubr.bf16.vlgmr.msra.gmra.mxu1 %v640_v43  ;;  %v1987_v43 = vld [vmem:[#allocation8 + $0x98] ss:$12 sps:$4 sm:$0xff]  }
 0x162   :  { %959 = vmatprep.mubr.bf16.mxu0 %v2116_v1  ;;  %1794 = vmatprep.mubr.msk.bf16.mxu1 %vm2117_vm0, %v2115_v0 }
 0x163   :  { %928 = vmatpush1.bf16.msra.mxu0 %v1930_v45  ;;  %1779 = vmatpush3.bf16.msra.mxu1 %v1933_v46  ;;  %v1988_v45 = vld [vmem:[#allocation8 + $0x80] ss:$12 sps:$4 sm:$0xff]   ;;  %v1973_v46 = vld [vmem:[#allocation8 + $0x64] ss:$12 sps:$4 sm:$0xff]  }
 0x164   :  { %1780 = vmatprep.subr.bf16.mxu1 %v2115_v0  ;;  %929 = vmatprep.subr.bf16.mxu0 %v1936_v47  ;;  %v1971_v47 = vld [vmem:[#allocation8 + $0x60] ss:$12 sps:$4 sm:$0xff]  }
 0x167   :  { %930 = vmatpush1.bf16.msra.mxu0 %v1934_v48  ;;  %1781 = vmatpush3.bf16.msra.mxu1 %v1937_v49  ;;  %v1989_v48 = vld [vmem:[#allocation8 + $0x68] ss:$12 sps:$4 sm:$0xff]   ;;  %v1976_v49 = vld [vmem:[#allocation8 + $0x4c] ss:$12 sps:$4 sm:$0xff]  }
 0x168   :  { %1782 = vmatprep.subr.bf16.mxu1 %v2115_v0  ;;  %931 = vmatprep.subr.bf16.mxu0 %v1940_v50  ;;  %v1974_v50 = vld [vmem:[#allocation8 + $0x48] ss:$12 sps:$4 sm:$0xff]  }
 0x16b   :  { %932 = vmatpush1.bf16.msra.mxu0 %v1938_v51  ;;  %1783 = vmatpush3.bf16.msra.mxu1 %v1941_v52  ;;  %v1990_v51 = vld [vmem:[#allocation8 + $0x50] ss:$12 sps:$4 sm:$0xff]   ;;  %v1979_v52 = vld [vmem:[#allocation8 + $0x34] ss:$12 sps:$4 sm:$0xff]  }
 0x16c   :  { %1784 = vmatprep.subr.bf16.mxu1 %v2115_v0  ;;  %933 = vmatprep.subr.bf16.mxu0 %v1944_v53  ;;  %v1977_v53 = vld [vmem:[#allocation8 + $0x30] ss:$12 sps:$4 sm:$0xff]  }
 0x16f   :  { %934 = vmatpush1.bf16.msra.mxu0 %v1942_v54  ;;  %1785 = vmatpush3.bf16.msra.mxu1 %v1945_v55  ;;  %v1991_v54 = vld [vmem:[#allocation8 + $0x38] ss:$12 sps:$4 sm:$0xff]   ;;  %v1982_v55 = vld [vmem:[#allocation8 + $0x1c] ss:$12 sps:$4 sm:$0xff]  }
 0x170   :  { %935 = vmatprep.subr.bf16.mxu0 %v1948_v59  ;;  %1786 = vmatprep.subr.bf16.mxu1 %v2115_v0  ;;  %v1992_v59 = vld [vmem:[#allocation8 + $0x20] ss:$12 sps:$4 sm:$0xff]  }
 0x173   :  { %936 = vmatpush1.bf16.msra.mxu0 %v1946_v58  ;;  %1787 = vmatpush3.bf16.msra.mxu1 %v1949_v61  ;;  %v1980_v58 = vld [vmem:[#allocation8 + $0x18] ss:$12 sps:$4 sm:$0xff]  }
 0x174   :  { %937 = vmatprep.subr.bf16.mxu0 %v1952_v62  ;;  %1788 = vmatprep.subr.bf16.mxu1 %v2115_v0  ;;  %v1986_v61 = vld [vmem:[#allocation8 + $0x4] ss:$12 sps:$4 sm:$0xff]   ;;  %v1984_v62 = vld [vmem:[#allocation8] ss:$12 sps:$4 sm:$0xff]  }
 0x177   :  { %938 = vmatpush1.bf16.msra.mxu0 %v1950_v63  ;;  %1789 = vmatpush3.bf16.msra.mxu1 %v1953_v2  ;;  %v1993_v2 = vld [vmem:[#allocation8 + $0x8] ss:$12 sps:$4 sm:$0xff]  }
 0x178   :  { %939 = vmatprep.subr.bf16.mxu0 %v1956_v4  ;;  %1790 = vmatprep.subr.bf16.mxu1 %v2115_v0 }
 0x17b   :  { %940 = vmatpush1.bf16.msra.mxu0 %v1954_v7  ;;  %1791 = vmatpush3.bf16.msra.mxu1 %v1957_v8 }
 0x17c   :  { %941 = vmatprep.subr.bf16.mxu0 %v1960_v9  ;;  %1792 = vmatprep.subr.bf16.mxu1 %v2115_v0 }
 0x17f   :  { %942 = vmatpush1.bf16.msra.mxu0 %v1958_v10  ;;  %1793 = vmatpush3.bf16.msra.mxu1 %v1961_v12 }
 0x180   :  { %1190 = vmatprep.subr.bf16.mxu0 %v2376_v13  ;;  %1798 = vmatprep.subr.bf16.mxu1 %v2115_v0 }
 0x221   :  { %v675_v14 = vpop.f32.mrf.mxu0  ;;  %v716_v15 = vpop.f32.mrf.mxu1 }
 0x222   :  { %v722_v16 = vadd.f32 %v675_v14, %v2347_v3  ;;  %v736_v31 = vadd.f32 %v2359_v30, %v716_v15 }
 0x223   :  { %v677_v17 = vpop.f32.mrf.mxu0  ;;  %v1776_v18 = vpop.f32.mrf.mxu1 }
 0x224   :  { %v1589_v19 = vmul.f32 -1.442695, %v722_v16  ;;  %v729_v24 = vadd.f32 %v677_v17, %v2350_v6 }
 0x225   :  { %v679_v20 = vpop.f32.mrf.mxu0  ;;  %v719_v21 = vpop.f32.mrf.mxu1 }
 0x226   :  { %2012 = vpow2.f32 %v1589_v19  ;;  %v1590_v25 = vmul.f32 -1.442695, %v729_v24 }
 0x227   :  { %v680_v22 = vpop.f32.mrf.mxu0  ;;  %v1777_v23 = vpop.f32.mrf.mxu1 }
 0x228   :  { %2014 = vpow2.f32 %v1590_v25 }
 0x233   :  { %v2013_v26 = vpop.eup %2012 }
 0x234   :  { %v726_v27 = vadd.f32 1.0, %v2013_v26 }
 0x235   :  { %v2015_v28 = vpop.eup %2014 }
 0x236   :  { %2016 = vrcp.f32 %v726_v27  ;;  %v733_v29 = vadd.f32 1.0, %v2015_v28 }
 0x238   :  { %2018 = vrcp.f32 %v733_v29 }
 0x243   :  { %v2017_v3 = vpop.eup %2016 }
 0x244   :  { %v737_v32 = vmul.f32 %v2017_v3, %v736_v31 }
 0x245   :  { %v2019_v34 = vpop.eup %2018 }
 0x246   :  { %v738_v33 = vadd.f32 %v737_v32, %v2354_v11  ;;  %v740_v35 = vsub.f32 1.0, %v2019_v34  ;;  %v742_v6 = vmul.f32 %v2019_v34, %v2363_v42  ;;  %v2395_v11 = vld [vmem:[#allocation8 + $0x90] ss:$12 sps:$4 sm:$0xff]  }
 0x248   :  { %2020 = vtanh.f32 %v738_v33 }
 0x255   :  { %v2021_v36 = vpop.eup %2020 }
 0x256   :  { %v741_v37 = vmul.f32 %v2021_v36, %v740_v35  ;;  %v2450_v35 = vld [vmem:[%s2514_s9] ss:$0 sm:$0xff] }
 0x258   :  { %v743_v38 = vadd.f32 %v742_v6, %v741_v37 }
 0x25a   :  { %746 = vst [vmem:[%s2518_s13] sm:$0xff] %v743_v38  ;;  %v749_v30 = vpack.c.bf16 %v743_v38, %v2363_v42  ;;  %v1968_v42 = vld [vmem:[#allocation8 + $0x78] ss:$12 sps:$4 sm:$0xff]  }
 0x25c   :  { %960 = vmatmul.mubr.bf16.vlgmr.msra.gmra.mxu0 %v749_v30  ;;  %1795 = vmatmul.mubr.bf16.vlgmr.msra.gmra.mxu1 %v749_v30 }
 0x25d   :  { %1191 = vmatpush1.bf16.msra.mxu0 %v2386_v39  ;;  %1799 = vmatpush3.bf16.msra.mxu1 %v2388_v40 }
 0x25e   :  { %1192 = vmatprep.subr.bf16.mxu0 %v1967_v41  ;;  %1800 = vmatprep.subr.bf16.mxu1 %v2115_v0 }
 0x25f   :  { %1222 = vmatprep.mubr.bf16.mxu0 %v2116_v1  ;;  %1814 = vmatprep.mubr.msk.bf16.mxu1 %vm2117_vm0, %v2115_v0 }
 0x261   :  { %1193 = vmatpush1.bf16.msra.mxu0 %v2395_v11  ;;  %1801 = vmatpush3.bf16.msra.mxu1 %v1987_v43  ;;  %v2411_v63 = vld [vmem:[%s2506_s1 + $0x8] sm:$0xff] }
 0x262   :  { %1194 = vmatprep.subr.bf16.mxu0 %v1970_v44  ;;  %1802 = vmatprep.subr.bf16.mxu1 %v2115_v0  ;;  %v1061_v4 = vpack.c.bf16 %v2411_v63, %v2411_v63 }
 0x265   :  { %1195 = vmatpush1.bf16.msra.mxu0 %v1968_v42  ;;  %1803 = vmatpush3.bf16.msra.mxu1 %v1988_v45 }
 0x266   :  { %1196 = vmatprep.subr.bf16.mxu0 %v1973_v46  ;;  %1804 = vmatprep.subr.bf16.mxu1 %v2115_v0 }
 0x269   :  { %1197 = vmatpush1.bf16.msra.mxu0 %v1971_v47  ;;  %1805 = vmatpush3.bf16.msra.mxu1 %v1989_v48 }
 0x26a   :  { %1198 = vmatprep.subr.bf16.mxu0 %v1976_v49  ;;  %1806 = vmatprep.subr.bf16.mxu1 %v2115_v0 }
 0x26d   :  { %1199 = vmatpush1.bf16.msra.mxu0 %v1974_v50  ;;  %1807 = vmatpush3.bf16.msra.mxu1 %v1990_v51 }
 0x26e   :  { %1200 = vmatprep.subr.bf16.mxu0 %v1979_v52  ;;  %1808 = vmatprep.subr.bf16.mxu1 %v2115_v0 }
 0x271   :  { %1201 = vmatpush1.bf16.msra.mxu0 %v1977_v53  ;;  %1809 = vmatpush3.bf16.msra.mxu1 %v1991_v54 }
 0x272   :  { %1202 = vmatprep.subr.bf16.mxu0 %v1982_v55  ;;  %1810 = vmatprep.subr.bf16.mxu1 %v2115_v0 }
 0x275   :  { %1203 = vmatpush1.bf16.msra.mxu0 %v1980_v58  ;;  %1811 = vmatpush3.bf16.msra.mxu1 %v1992_v59 }
 0x276   :  { %1204 = vmatprep.subr.bf16.mxu0 %v1986_v61  ;;  %1812 = vmatprep.subr.bf16.mxu1 %v2115_v0 }
 0x279   :  { %1205 = vmatpush1.bf16.msra.mxu0 %v1984_v62  ;;  %1813 = vmatpush3.bf16.msra.mxu1 %v1993_v2 }
 0x27a   :  { %1298 = vmatprep.subr.bf16.mxu0 %v2376_v13  ;;  %1818 = vmatprep.subr.bf16.mxu1 %v2115_v0 }
 0x27c   :  { %1223 = vmatmul.mubr.bf16.vlgmr.msra.gmra.mxu0 %v1061_v4  ;;  %1815 = vmatmul.mubr.bf16.vlgmr.msra.gmra.mxu1 %v1061_v4 }
 0x27d   :  { %1299 = vmatpush1.bf16.msra.mxu0 %v2386_v39  ;;  %1819 = vmatpush3.bf16.msra.mxu1 %v2388_v40 }
 0x27e   :  { %1300 = vmatprep.subr.bf16.mxu0 %v1967_v41  ;;  %1820 = vmatprep.subr.bf16.mxu1 %v2115_v0 }
 0x27f   :  { %1330 = vmatprep.mubr.bf16.mxu0 %v2116_v1  ;;  %1834 = vmatprep.mubr.msk.bf16.mxu1 %vm2117_vm0, %v2115_v0  ;;  %v782_v1 = vld [vmem:[%s2513_s8] sm:$0x7] }
 0x280   :  { %v787_v12 = vrot.slane %v782_v1, %v124_v57  ;;  %v795_v13 = vrot.slane %v782_v1, %v132_v5  ;;  %v791_v16 = vrot.slane %v782_v1, %v128_v60 }
 0x281   :  { %1301 = vmatpush1.bf16.msra.mxu0 %v2395_v11  ;;  %1821 = vmatpush3.bf16.msra.mxu1 %v1987_v43 }
 0x282   :  { %1302 = vmatprep.subr.bf16.mxu0 %v1970_v44  ;;  %1822 = vmatprep.subr.bf16.mxu1 %v2115_v0 }
 0x285   :  { %1303 = vmatpush1.bf16.msra.mxu0 %v1968_v42  ;;  %1823 = vmatpush3.bf16.msra.mxu1 %v1988_v45  ;;  %v1994_v45 = vld [vmem:[%s2515_s10 + $0x38] sm:$0xff]  }
 0x286   :  { %1304 = vmatprep.subr.bf16.mxu0 %v1973_v46  ;;  %1824 = vmatprep.subr.bf16.mxu1 %v2115_v0 }
 0x289   :  { %1305 = vmatpush1.bf16.msra.mxu0 %v1971_v47  ;;  %1825 = vmatpush3.bf16.msra.mxu1 %v1989_v48  ;;  %v1995_v47 = vld [vmem:[%s2515_s10 + $0x30] sm:$0xff]   ;;  %v1996_v48 = vld [vmem:[%s2515_s10 + $0x28] sm:$0xff]  }
 0x28a   :  { %1306 = vmatprep.subr.bf16.mxu0 %v1976_v49  ;;  %1826 = vmatprep.subr.bf16.mxu1 %v2115_v0  ;;  %v1997_v49 = vld [vmem:[%s2515_s10 + $0x20] sm:$0xff]  }
 0x28d   :  { %1307 = vmatpush1.bf16.msra.mxu0 %v1974_v50  ;;  %1827 = vmatpush3.bf16.msra.mxu1 %v1990_v51  ;;  %v1998_v50 = vld [vmem:[%s2515_s10 + $0x18] sm:$0xff]   ;;  %v1999_v51 = vld [vmem:[%s2515_s10 + $0x10] sm:$0xff]  }
 0x28e   :  { %1308 = vmatprep.subr.bf16.mxu0 %v1979_v52  ;;  %1828 = vmatprep.subr.bf16.mxu1 %v2115_v0  ;;  %v2000_v52 = vld [vmem:[%s2515_s10 + $0x8] sm:$0xff]  }
 0x291   :  { %1309 = vmatpush1.bf16.msra.mxu0 %v1977_v53  ;;  %1829 = vmatpush3.bf16.msra.mxu1 %v1991_v54  ;;  %v2001_v53 = vld [vmem:[%s2515_s10] sm:$0xff]  }
 0x292   :  { %1310 = vmatprep.subr.bf16.mxu0 %v1982_v55  ;;  %1830 = vmatprep.subr.bf16.mxu1 %v2115_v0 }
 0x295   :  { %1311 = vmatpush1.bf16.msra.mxu0 %v1980_v58  ;;  %1831 = vmatpush3.bf16.msra.mxu1 %v1992_v59 }
 0x296   :  { %1312 = vmatprep.subr.bf16.mxu0 %v1986_v61  ;;  %1832 = vmatprep.subr.bf16.mxu1 %v2115_v0 }
 0x299   :  { %1313 = vmatpush1.bf16.msra.mxu0 %v1984_v62  ;;  %1833 = vmatpush3.bf16.msra.mxu1 %v1993_v2 }
 0x29a   :  { %1838 = vmatprep.subr.bf16.mxu0 %v2115_v0 }
 0x31c   :  { %v961_v7 = vpop.f32.mrf.mxu0  ;;  %v1004_v8 = vpop.f32.mrf.mxu1 }
 0x31d   :  { %v962_v22 = vadd.f32 %v961_v7, %v787_v12  ;;  %v1005_v38 = vadd.f32 %v1004_v8, %v795_v13 }
 0x31e   :  { %v963_v9 = vpop.f32.mrf.mxu0  ;;  %v1796_v10 = vpop.f32.mrf.mxu1 }
 0x31f   :  { %v964_v29 = vadd.f32 %v963_v9, %v791_v16 }
 0x320   :  { %v965_v14 = vpop.f32.mrf.mxu0  ;;  %v1007_v15 = vpop.f32.mrf.mxu1 }
 0x321   :  { %v2441_v17 = vadd.f32 %v965_v14, %v787_v12  ;;  %v2443_v18 = vadd.f32 %v1007_v15, %v795_v13  ;;  %v1646_v12 = vld [vmem:[%s2516_s11] ss:$0 sm:$0xff] }
 0x322   :  { %v967_v19 = vpop.f32.mrf.mxu0  ;;  %v1797_v20 = vpop.f32.mrf.mxu1 }
 0x323   :  { %v2445_v21 = vadd.f32 %v967_v19, %v791_v16 }
 0x33c   :  { %v1224_v23 = vpop.f32.mrf.mxu0  ;;  %v1265_v24 = vpop.f32.mrf.mxu1 }
 0x33d   :  { %v1271_v57 = vadd.f32 %v1224_v23, %v962_v22  ;;  %v1285_v37 = vadd.f32 %v2450_v35, %v1265_v24 }
 0x33e   :  { %v1226_v25 = vpop.f32.mrf.mxu0  ;;  %v1816_v26 = vpop.f32.mrf.mxu1 }
 0x33f   :  { %v1641_v5 = vmul.f32 -1.442695, %v1271_v57  ;;  %v1278_v31 = vadd.f32 %v1226_v25, %v964_v29 }
 0x340   :  { %v1228_v27 = vpop.f32.mrf.mxu0  ;;  %v1268_v28 = vpop.f32.mrf.mxu1 }
 0x341   :  { %2022 = vpow2.f32 %v1641_v5  ;;  %v1642_v3 = vmul.f32 -1.442695, %v1278_v31 }
 0x342   :  { %v1229_v56 = vpop.f32.mrf.mxu0  ;;  %v1817_v60 = vpop.f32.mrf.mxu1 }
 0x343   :  { %2024 = vpow2.f32 %v1642_v3 }
 0x34e   :  { %v2023_v32 = vpop.eup %2022 }
 0x34f   :  { %v1275_v33 = vadd.f32 1.0, %v2023_v32 }
 0x350   :  { %v2025_v34 = vpop.eup %2024 }
 0x351   :  { %2026 = vrcp.f32 %v1275_v33  ;;  %v1282_v36 = vadd.f32 1.0, %v2025_v34 }
 0x353   :  { %2028 = vrcp.f32 %v1282_v36 }
 0x35e   :  { %v2027_v6 = vpop.eup %2026 }
 0x35f   :  { %v1286_v39 = vmul.f32 %v2027_v6, %v1285_v37 }
 0x360   :  { %v2029_v30 = vpop.eup %2028 }
 0x361   :  { %v1287_v40 = vadd.f32 %v1286_v39, %v1005_v38  ;;  %v1289_v41 = vsub.f32 1.0, %v2029_v30  ;;  %v1291_v44 = vmul.f32 %v2029_v30, %v2411_v63 }
 0x363   :  { %2030 = vtanh.f32 %v1287_v40 }
 0x370   :  { %v2031_v11 = vpop.eup %2030 }
 0x371   :  { %v1290_v43 = vmul.f32 %v2031_v11, %v1289_v41 }
 0x373   :  { %v2454_v42 = vadd.f32 %v1291_v44, %v1290_v43 }
 0x375   :  { %v1297_v46 = vpack.c.bf16 %v2454_v42, %v2454_v42 }
 0x377   :  { %1331 = vmatmul.mubr.bf16.vlgmr.msra.gmra.mxu0 %v1297_v46  ;;  %1835 = vmatmul.mubr.bf16.vlgmr.msra.gmra.mxu1 %v1297_v46 }
 0x378   :  { %1839 = vmatpush3.bf16.msra.mxu0 %v1994_v45  ;;  %1854 = vmatprep.mubr.msk.bf16.mxu0 %vm2117_vm0, %v2115_v0 }
 0x379   :  { %1840 = vmatprep.subr.bf16.mxu0 %v2115_v0 }
 0x37c   :  { %1841 = vmatpush3.bf16.msra.mxu0 %v1995_v47 }
 0x37d   :  { %1842 = vmatprep.subr.bf16.mxu0 %v2115_v0 }
 0x380   :  { %1843 = vmatpush3.bf16.msra.mxu0 %v1996_v48 }
 0x381   :  { %1844 = vmatprep.subr.bf16.mxu0 %v2115_v0 }
 0x384   :  { %1845 = vmatpush3.bf16.msra.mxu0 %v1997_v49 }
 0x385   :  { %1846 = vmatprep.subr.bf16.mxu0 %v2115_v0 }
 0x388   :  { %1847 = vmatpush3.bf16.msra.mxu0 %v1998_v50 }
 0x389   :  { %1848 = vmatprep.subr.bf16.mxu0 %v2115_v0 }
 0x38c   :  { %1849 = vmatpush3.bf16.msra.mxu0 %v1999_v51 }
 0x38d   :  { %1850 = vmatprep.subr.bf16.mxu0 %v2115_v0 }
 0x390   :  { %1851 = vmatpush3.bf16.msra.mxu0 %v2000_v52 }
 0x391   :  { %1852 = vmatprep.subr.bf16.mxu0 %v2115_v0 }
 0x394   :  { %1853 = vmatpush3.bf16.msra.mxu0 %v2001_v53 }
 0x397   :  { %1855 = vmatmul.mubr.bf16.vlgmr.msra.gmra.mxu0 %v1297_v46 }
 0x437   :  { %v1332_v54 = vpop.f32.mrf.mxu0  ;;  %v1373_v55 = vpop.f32.mrf.mxu1 }
 0x438   :  { %v1379_v58 = vadd.f32 %v1332_v54, %v2441_v17  ;;  %v1393_v15 = vadd.f32 %v2450_v35, %v1373_v55 }
 0x439   :  { %v1334_v59 = vpop.f32.mrf.mxu0  ;;  %v1836_v61 = vpop.f32.mrf.mxu1 }
 0x43a   :  { %v1643_v62 = vmul.f32 -1.442695, %v1379_v58  ;;  %v1386_v7 = vadd.f32 %v1334_v59, %v2445_v21 }
 0x43b   :  { %v1336_v63 = vpop.f32.mrf.mxu0  ;;  %v1376_v2 = vpop.f32.mrf.mxu1 }
 0x43c   :  { %2032 = vpow2.f32 %v1643_v62  ;;  %v1644_v8 = vmul.f32 -1.442695, %v1386_v7 }
 0x43d   :  { %v1337_v4 = vpop.f32.mrf.mxu0  ;;  %v1837_v1 = vpop.f32.mrf.mxu1 }
 0x43e   :  { %2034 = vpow2.f32 %v1644_v8 }
 0x449   :  { %v2033_v9 = vpop.eup %2032 }
 0x44a   :  { %v1383_v0 = vadd.f32 1.0, %v2033_v9 }
 0x44b   :  { %v2035_v10 = vpop.eup %2034 }
 0x44c   :  { %2036 = vrcp.f32 %v1383_v0  ;;  %v1390_v13 = vadd.f32 1.0, %v2035_v10 }
 0x44e   :  { %2038 = vrcp.f32 %v1390_v13 }
 0x457   :  { %v1510_v14 = vpop.f32.mrf.mxu0 }
 0x458   :  { %v1511_v16 = vadd.f32 %v1646_v12, %v1510_v14 }
 0x459   :  { %v2037_v17 = vpop.eup %2036  ;;  %v1856_v19 = vpop.f32.mrf.mxu0 }
 0x45a   :  { %v1394_v20 = vmul.f32 %v2037_v17, %v1393_v15  ;;  %1516 = vmax.xlane.f32.xlu0 %v1511_v16 }
 0x45b   :  { %v1513_v21 = vpop.f32.mrf.mxu0  ;;  %v2039_v24 = vpop.eup %2038 }
 0x45c   :  { %v1395_v22 = vadd.f32 %v1394_v20, %v2443_v18  ;;  %v1397_v57 = vsub.f32 1.0, %v2039_v24  ;;  %v1399_v5 = vmul.f32 %v2039_v24, %v2454_v42 }
 0x45d   :  { %v1857_v23 = vpop.f32.mrf.mxu0 }
 0x45e   :  { %2040 = vtanh.f32 %v1395_v22 }
 0x46b   :  { %v2041_v25 = vpop.eup %2040 }
 0x46c   :  { %v1398_v26 = vmul.f32 %v2041_v25, %v1397_v57 }
 0x46e   :  { %v1400_v27 = vadd.f32 %v1399_v5, %v1398_v26 }
 0x470   :  { %1645 = vst [vmem:[%s2518_s13 + $0x8] sm:$0xff] %v1400_v27 }
 0x4e3   :  { %v1517_v28 = vpop.xlane.xlu0 %1516 }
 0x4e4   :  { %v1518_v29 = vsub.f32 %v1511_v16, %v1517_v28 }
 0x4e6   :  { %v1519_v56 = vmul.f32 1.442695, %v1518_v29 }
 0x4e8   :  { %2042 = vpow2.f32 %v1519_v56 }
 0x4f5   :  { %v2043_v60 = vpop.eup %2042 }
 0x4f6   :  { %1521 = vadd.xlane.f32.xlu0 %v2043_v60 }
 0x57f   :  { %v1522_v18 = vpop.xlane.xlu0 %1521 }
 0x580   :  { %2044 = vlog2.f32 %v1522_v18 }
 0x58d   :  { %v2045_v31 = vpop.eup %2044 }
 0x58e   :  { %v1524_v3 = vmul.f32 0.6931472, %v2045_v31 }
 0x590   :  { %v1525_v32 = vsub.f32 %v1518_v29, %v1524_v3 }
 0x592   :  { %1526 = vst [vmem:[%s2517_s12] sm:$0xff] %v1525_v32 }
 0x593   :  { %1535 = vsyncpa [#allocation5], 1 }
 0x594   :  { %1536 = vsyncpa [#allocation7], 1 }

</bundles_post_ra>
